<compile_context>
chip_gen: v7x
topology: tpu7x:2x2x1
jax: 0.10.0
libtpu: 0.0.40
codegen_flags: <defaults>
</compile_context>

<pallas_src>
import jax
import jax.numpy as jnp
from jax.experimental import pallas as pl
from jax.experimental.pallas import tpu as pltpu


def _round_up(n, m):
    return ((n + m - 1) // m) * m


def scoring_kernel(x_ref, w1_ref, b1_ref, w2_ref, b2_ref, w3_ref, b3_ref, out_ref):
    """One batch-tile of the full forward pass.

    x_ref  : (2, TB, 256) f32   (x1 tile stacked with x2 tile; bf16 cast happens here)
    w1_ref : (256, 512) bf16, b1_ref : (1, 512) f32
    w2_ref : (512, 256) bf16, b2_ref : (1, 256) f32
    w3_ref : (1, 256)   f32   (head weights as a lane row, VPU multiply + lane reduce)
    b3_ref : (1,)       f32   (SMEM scalar)
    out_ref: (1, 1, TB) f32   (lane-dense row of scores)
    """
    tb = x_ref.shape[1]
    d = x_ref.shape[2]

    # (2, tb, d) -> (2*tb, d): layout-preserving merge of leading dims; cast to bf16 for the MXU.
    x = x_ref[...].reshape(2 * tb, d).astype(w1_ref.dtype)

    h = jnp.dot(x, w1_ref[...], preferred_element_type=jnp.float32) + b1_ref[...]
    h = jnp.maximum(h, 0.0)                                          # f32
    h = jnp.dot(h.astype(w2_ref.dtype), w2_ref[...],
                preferred_element_type=jnp.float32) + b2_ref[...]
    h = jnp.maximum(h, 0.0)                                          # (2*tb, 256) f32

    hsum = h[:tb, :] + h[tb:, :]                                     # (tb, 256) f32

    # 256 -> 1 head as a VPU multiply + lane reduction (avoid an N=1 MXU matmul), then relayout
    # the (tb, 1) logit column into the lane-dense (1, 1, tb) output row (one XLU move).
    logit = jnp.sum(hsum * w3_ref[...], axis=-1, keepdims=True) + b3_ref[0]   # (tb, 1)
    out_ref[...] = jax.nn.sigmoid(logit).reshape(1, 1, tb).astype(out_ref.dtype)


def _tpu_kind():
    try:
        return jax.devices()[0].device_kind.lower()
    except Exception:
        return ""


def _pick_tb(batch, two_tensorcores):
    """Batch tile selection.

    Single-TC chips (v5e/v6e): one big tile (grid "parallel" splitting is just a serial loop
    there, so splitting only adds per-step overhead). v7x: aim for >= 2 grid steps so both
    TensorCores get work, tb capped at 1024 to respect 64 MiB VMEM.
    """
    cap = 1024                              # fused M = 2*tb = 2048; ~15 MiB VMEM footprint
    b16 = _round_up(batch, 16)              # bf16 packs 16 rows per vreg sublane group
    if two_tensorcores and b16 >= 256:
        tb = min(_round_up((b16 + 1) // 2, 128), cap)
    else:
        tb = min(b16, cap)
    if tb >= 128:
        tb = _round_up(tb, 128)             # unmasked lane-dense output stores
    return tb


def scoring_network(x1, x2, params, *, tb=None):
    """params = dict(w1 (256,512), b1 (512,), w2 (512,256), b2 (256,), w3 (256,1), b3 (1,))."""
    B, D = x1.shape
    assert x2.shape == (B, D) and D == 256

    is_v7 = "v7" in _tpu_kind()
    if tb is None:
        tb = _pick_tb(B, two_tensorcores=is_v7)
    Bp = _round_up(max(B, tb), tb)

    # Stack x1/x2 once (single input + single DMA per step); keep them f32 — cast is in-kernel.
    x = jnp.stack([x1, x2], axis=0)                        # (2, B, 256) f32
    if Bp != B:
        x = jnp.pad(x, ((0, 0), (0, Bp - B), (0, 0)))      # zero rows are sliced off afterwards

    wdtype = jnp.bfloat16
    w1 = params["w1"].astype(wdtype)                       # (256, 512)
    b1 = params["b1"].reshape(1, -1).astype(jnp.float32)   # (1, 512)
    w2 = params["w2"].astype(wdtype)                       # (512, 256)
    b2 = params["b2"].reshape(1, -1).astype(jnp.float32)   # (1, 256)
    w3 = params["w3"].reshape(1, -1).astype(jnp.float32)   # (1, 256) lane row for the VPU head
    b3 = params["b3"].reshape(1).astype(jnp.float32)       # (1,) scalar -> SMEM

    H1 = w1.shape[1]   # 512
    H2 = w2.shape[1]   # 256
    grid = (Bp // tb,)

    flops = int(2 * (2 * Bp) * (D * H1 + H1 * H2) + 2 * Bp * H2)
    bytes_accessed = int(x.size * 4 + (w1.size + w2.size) * 2
                         + (b1.size + b2.size + w3.size + b3.size) * 4 + Bp * 4)
    cost = pl.CostEstimate(flops=flops, transcendentals=int(Bp),
                           bytes_accessed=bytes_accessed)

    # 48 MiB scoped VMEM: enough for tb=1024 on v5e (default ~16 MiB would be too small),
    # comfortably under v7x's 64 MiB physical per-TensorCore VMEM.
    vmem_limit = 48 * 1024 * 1024

    def build(weight_mode):
        def wspec(shape):
            if weight_mode is None:
                return pl.BlockSpec(shape, lambda i: (0, 0))
            return pl.BlockSpec(shape, lambda i: (0, 0), pipeline_mode=weight_mode)

        return pl.pallas_call(
            scoring_kernel,
            out_shape=jax.ShapeDtypeStruct((Bp // tb, 1, tb), jnp.float32),
            grid_spec=pltpu.PrefetchScalarGridSpec(
                num_scalar_prefetch=0,
                grid=grid,
                in_specs=[
                    pl.BlockSpec((2, tb, D), lambda i: (0, i, 0)),      # stacked x1/x2 tile (f32)
                    wspec((D, H1)),                                     # w1
                    wspec((1, H1)),                                     # b1
                    wspec((H1, H2)),                                    # w2
                    wspec((1, H2)),                                     # b2
                    wspec((1, H2)),                                     # w3 lane row
                    pl.BlockSpec(memory_space=pltpu.MemorySpace.SMEM),  # b3 scalar
                ],
                out_specs=pl.BlockSpec((1, 1, tb), lambda i: (i, 0, 0)),  # lane-dense score row
            ),
            compiler_params=pltpu.CompilerParams(
                dimension_semantics=("parallel",),
                vmem_limit_bytes=vmem_limit,
            ),
            cost_estimate=cost,
        )

    args = (x, w1, b1, w2, b2, w3, b3)
    try:
        # Weights/biases have a constant index_map -> single-buffer them (saves VMEM + prologue DMAs).
        out = build(pl.Buffered(1))(*args)
    except Exception:
        # Fallback: default double-buffering if Buffered(1) is unsupported in this jax version.
        out = build(None)(*args)

    # (G, 1, tb) -> (Bp, 1): flat index g*tb + j is the padded batch index.
    return out.reshape(Bp, 1)[:B]


def init_params(key):
    """Deterministic synthetic parameters matching the nn.Linear shapes
    (uniform(-1/sqrt(fan_in), 1/sqrt(fan_in)), like PyTorch's default init)."""
    ks = jax.random.split(key, 6)

    def lin(kw, kb, fan_in, fan_out):
        bound = 1.0 / jnp.sqrt(fan_in)
        w = jax.random.uniform(kw, (fan_in, fan_out), jnp.float32, -bound, bound)
        b = jax.random.uniform(kb, (fan_out,), jnp.float32, -bound, bound)
        return w, b

    w1, b1 = lin(ks[0], ks[1], 256, 512)
    w2, b2 = lin(ks[2], ks[3], 512, 256)
    w3, b3 = lin(ks[4], ks[5], 256, 1)
    return dict(w1=w1, b1=b1, w2=w2, b2=b2, w3=w3, b3=b3)


def reference(x1, x2, p):
    """Matches the kernel's numerics: bf16 matmul operands, f32 accumulation/elementwise."""
    bf = lambda a: a.astype(jnp.bfloat16)

    def shared(x):
        h = jnp.dot(bf(x), bf(p["w1"]), preferred_element_type=jnp.float32) + p["b1"]
        h = jnp.maximum(h, 0.0)
        h = jnp.dot(bf(h), bf(p["w2"]), preferred_element_type=jnp.float32) + p["b2"]
        return jnp.maximum(h, 0.0)

    h = shared(x1) + shared(x2)
    logit = jnp.sum(h * p["w3"].reshape(1, -1), axis=-1, keepdims=True) + p["b3"]
    return jax.nn.sigmoid(logit)


if __name__ == "__main__":
    key = jax.random.PRNGKey(0)
    kp, k1, k2 = jax.random.split(key, 3)

    B, D = 16, 256
    params = init_params(kp)
    x1 = jax.random.normal(k1, (B, D), jnp.float32)
    x2 = jax.random.normal(k2, (B, D), jnp.float32)

    out = scoring_network(x1, x2, params)
    out = jax.block_until_ready(out)

    ref = reference(x1, x2, params)
    assert out.shape == (B, 1)
    assert jnp.allclose(out, ref, atol=2e-3, rtol=0.0), "mismatch vs bf16-matched reference"

    print("KERNEL_OK")
</pallas_src>

<mosaic_0001>
module attributes {stable_mosaic.version = 11 : i64} {
  func.func @scoring_kernel(%arg0: i32, %arg1: memref<2x16x256xf32, #tpu.memory_space<vmem>>, %arg2: memref<256x512xbf16, #tpu.memory_space<vmem>>, %arg3: memref<1x512xf32, #tpu.memory_space<vmem>>, %arg4: memref<512x256xbf16, #tpu.memory_space<vmem>>, %arg5: memref<1x256xf32, #tpu.memory_space<vmem>>, %arg6: memref<1x256xf32, #tpu.memory_space<vmem>>, %arg7: memref<1xf32, #tpu.memory_space<smem>>, %arg8: memref<1x1x16xf32, #tpu.memory_space<vmem>>) attributes {dimension_semantics = [#tpu.dimension_semantics<parallel>], iteration_bounds = array<i64: 1>, scalar_prefetch = 0 : i64, scratch_operands = 0 : i64, tpu.core_type = #tpu.core_type<tc>, window_params = [{transform_indices = @transform_0, window_bounds = array<i64: 2, 16, 256>}, {pipeline_mode = #tpu.pipeline_mode<synchronous>, transform_indices = @transform_1, window_bounds = array<i64: 256, 512>}, {pipeline_mode = #tpu.pipeline_mode<synchronous>, transform_indices = @transform_2, window_bounds = array<i64: 1, 512>}, {pipeline_mode = #tpu.pipeline_mode<synchronous>, transform_indices = @transform_3, window_bounds = array<i64: 512, 256>}, {pipeline_mode = #tpu.pipeline_mode<synchronous>, transform_indices = @transform_4, window_bounds = array<i64: 1, 256>}, {pipeline_mode = #tpu.pipeline_mode<synchronous>, transform_indices = @transform_5, window_bounds = array<i64: 1, 256>}, {transform_indices = @transform_6, window_bounds = array<i64: 1>}, {transform_indices = @transform_7, window_bounds = array<i64: 1, 1, 16>}]} {
    %c0 = arith.constant 0 : index
    %c0_0 = arith.constant 0 : index
    %c0_1 = arith.constant 0 : index
    %0 = vector.load %arg1[%c0, %c0_0, %c0_1] : memref<2x16x256xf32, #tpu.memory_space<vmem>>, vector<2x16x256xf32>
    %1 = vector.shape_cast %0 : vector<2x16x256xf32> to vector<32x256xf32>
    %2 = arith.truncf %1 : vector<32x256xf32> to vector<32x256xbf16>
    %c0_2 = arith.constant 0 : index
    %c0_3 = arith.constant 0 : index
    %3 = vector.load %arg2[%c0_2, %c0_3] : memref<256x512xbf16, #tpu.memory_space<vmem>>, vector<256x512xbf16>
    %cst = arith.constant dense<0.000000e+00> : vector<32x512xf32>
    %4 = tpu.matmul %2, %3, %cst {dimension_numbers = #tpu.dot_dimension_numbers<[1], [0], [0], [1], [0, 0, 1, 1], [], []>} : vector<32x256xbf16>, vector<256x512xbf16>, vector<32x512xf32> -> vector<32x512xf32>
    %c0_4 = arith.constant 0 : index
    %c0_5 = arith.constant 0 : index
    %5 = vector.load %arg3[%c0_4, %c0_5] : memref<1x512xf32, #tpu.memory_space<vmem>>, vector<1x512xf32>
    %6 = vector.broadcast %5 : vector<1x512xf32> to vector<32x512xf32>
    %7 = arith.addf %4, %6 : vector<32x512xf32>
    %cst_6 = arith.constant 0.000000e+00 : f32
    %8 = vector.broadcast %cst_6 : f32 to vector<32x512xf32>
    %9 = arith.maximumf %7, %8 : vector<32x512xf32>
    %10 = arith.truncf %9 : vector<32x512xf32> to vector<32x512xbf16>
    %c0_7 = arith.constant 0 : index
    %c0_8 = arith.constant 0 : index
    %11 = vector.load %arg4[%c0_7, %c0_8] : memref<512x256xbf16, #tpu.memory_space<vmem>>, vector<512x256xbf16>
    %cst_9 = arith.constant dense<0.000000e+00> : vector<32x256xf32>
    %12 = tpu.matmul %10, %11, %cst_9 {dimension_numbers = #tpu.dot_dimension_numbers<[1], [0], [0], [1], [0, 0, 1, 1], [], []>} : vector<32x512xbf16>, vector<512x256xbf16>, vector<32x256xf32> -> vector<32x256xf32>
    %c0_10 = arith.constant 0 : index
    %c0_11 = arith.constant 0 : index
    %13 = vector.load %arg5[%c0_10, %c0_11] : memref<1x256xf32, #tpu.memory_space<vmem>>, vector<1x256xf32>
    %14 = vector.broadcast %13 : vector<1x256xf32> to vector<32x256xf32>
    %15 = arith.addf %12, %14 : vector<32x256xf32>
    %cst_12 = arith.constant 0.000000e+00 : f32
    %16 = vector.broadcast %cst_12 : f32 to vector<32x256xf32>
    %17 = arith.maximumf %15, %16 : vector<32x256xf32>
    %18 = vector.extract_strided_slice %17 {offsets = [0, 0], sizes = [16, 256], strides = [1, 1]} : vector<32x256xf32> to vector<16x256xf32>
    %19 = vector.extract_strided_slice %17 {offsets = [16, 0], sizes = [16, 256], strides = [1, 1]} : vector<32x256xf32> to vector<16x256xf32>
    %20 = arith.addf %18, %19 : vector<16x256xf32>
    %c0_13 = arith.constant 0 : index
    %c0_14 = arith.constant 0 : index
    %21 = vector.load %arg6[%c0_13, %c0_14] : memref<1x256xf32, #tpu.memory_space<vmem>>, vector<1x256xf32>
    %22 = vector.broadcast %21 : vector<1x256xf32> to vector<16x256xf32>
    %23 = arith.mulf %20, %22 : vector<16x256xf32>
    %cst_15 = arith.constant dense<0.000000e+00> : vector<16xf32>
    %24 = vector.multi_reduction <add>, %23, %cst_15 [1] : vector<16x256xf32> to vector<16xf32>
    %25 = vector.shape_cast %24 : vector<16xf32> to vector<16x1xf32>
    %c0_16 = arith.constant 0 : index
    %26 = memref.load %arg7[%c0_16] : memref<1xf32, #tpu.memory_space<smem>>
    %27 = vector.broadcast %26 : f32 to vector<16x1xf32>
    %28 = arith.addf %25, %27 : vector<16x1xf32>
    %29 = arith.negf %28 : vector<16x1xf32>
    %30 = math.exp %29 : vector<16x1xf32>
    %cst_17 = arith.constant 1.000000e+00 : f32
    %31 = vector.broadcast %cst_17 : f32 to vector<16x1xf32>
    %32 = arith.addf %31, %30 : vector<16x1xf32>
    %33 = arith.divf %31, %32 : vector<16x1xf32>
    %34 = vector.shape_cast %33 : vector<16x1xf32> to vector<1x1x16xf32>
    %c0_18 = arith.constant 0 : index
    %c0_19 = arith.constant 0 : index
    %c0_20 = arith.constant 0 : index
    %35 = vector.load %arg8[%c0_18, %c0_19, %c0_20] : memref<1x1x16xf32, #tpu.memory_space<vmem>>, vector<1x1x16xf32>
    tpu.vector_store %arg8[%c0_18, %c0_19, %c0_20], %34 {strides = array<i32>} : memref<1x1x16xf32, #tpu.memory_space<vmem>>, vector<1x1x16xf32>,
    return
  }
  func.func @transform_0(%arg0: i32) -> (i32, i32, i32) {
    %c0_i32 = arith.constant 0 : i32
    %c0_i32_0 = arith.constant 0 : i32
    %c0_i32_1 = arith.constant 0 : i32
    return %c0_i32, %arg0, %c0_i32_0 : i32, i32, i32
  }
  func.func @transform_1(%arg0: i32) -> (i32, i32) {
    %c0_i32 = arith.constant 0 : i32
    %c0_i32_0 = arith.constant 0 : i32
    %c0_i32_1 = arith.constant 0 : i32
    return %c0_i32, %c0_i32_0 : i32, i32
  }
  func.func @transform_2(%arg0: i32) -> (i32, i32) {
    %c0_i32 = arith.constant 0 : i32
    %c0_i32_0 = arith.constant 0 : i32
    %c0_i32_1 = arith.constant 0 : i32
    return %c0_i32, %c0_i32_0 : i32, i32
  }
  func.func @transform_3(%arg0: i32) -> (i32, i32) {
    %c0_i32 = arith.constant 0 : i32
    %c0_i32_0 = arith.constant 0 : i32
    %c0_i32_1 = arith.constant 0 : i32
    return %c0_i32, %c0_i32_0 : i32, i32
  }
  func.func @transform_4(%arg0: i32) -> (i32, i32) {
    %c0_i32 = arith.constant 0 : i32
    %c0_i32_0 = arith.constant 0 : i32
    %c0_i32_1 = arith.constant 0 : i32
    return %c0_i32, %c0_i32_0 : i32, i32
  }
  func.func @transform_5(%arg0: i32) -> (i32, i32) {
    %c0_i32 = arith.constant 0 : i32
    %c0_i32_0 = arith.constant 0 : i32
    %c0_i32_1 = arith.constant 0 : i32
    return %c0_i32, %c0_i32_0 : i32, i32
  }
  func.func @transform_6(%arg0: i32) -> i32 {
    %c0_i32 = arith.constant 0 : i32
    %c0_i32_0 = arith.constant 0 : i32
    return %c0_i32 : i32
  }
  func.func @transform_7(%arg0: i32) -> (i32, i32, i32) {
    %c0_i32 = arith.constant 0 : i32
    %c0_i32_0 = arith.constant 0 : i32
    %c0_i32_1 = arith.constant 0 : i32
    return %arg0, %c0_i32, %c0_i32_0 : i32, i32, i32
  }
}

module attributes {stable_mosaic.version = 11 : i64} {
  func.func @scoring_kernel(%arg0: i32, %arg1: memref<2x16x256xf32, #tpu.memory_space<vmem>>, %arg2: memref<256x512xbf16, #tpu.memory_space<vmem>>, %arg3: memref<1x512xf32, #tpu.memory_space<vmem>>, %arg4: memref<512x256xbf16, #tpu.memory_space<vmem>>, %arg5: memref<1x256xf32, #tpu.memory_space<vmem>>, %arg6: memref<1x256xf32, #tpu.memory_space<vmem>>, %arg7: memref<1xf32, #tpu.memory_space<smem>>, %arg8: memref<1x1x16xf32, #tpu.memory_space<vmem>>) attributes {dimension_semantics = [#tpu.dimension_semantics<parallel>], iteration_bounds = array<i64: 1>, scalar_prefetch = 0 : i64, scratch_operands = 0 : i64, tpu.core_type = #tpu.core_type<tc>, window_params = [{transform_indices = @transform_0, window_bounds = array<i64: 2, 16, 256>}, {pipeline_mode = #tpu.pipeline_mode<synchronous>, transform_indices = @transform_1, window_bounds = array<i64: 256, 512>}, {pipeline_mode = #tpu.pipeline_mode<synchronous>, transform_indices = @transform_2, window_bounds = array<i64: 1, 512>}, {pipeline_mode = #tpu.pipeline_mode<synchronous>, transform_indices = @transform_3, window_bounds = array<i64: 512, 256>}, {pipeline_mode = #tpu.pipeline_mode<synchronous>, transform_indices = @transform_4, window_bounds = array<i64: 1, 256>}, {pipeline_mode = #tpu.pipeline_mode<synchronous>, transform_indices = @transform_5, window_bounds = array<i64: 1, 256>}, {transform_indices = @transform_6, window_bounds = array<i64: 1>}, {transform_indices = @transform_7, window_bounds = array<i64: 1, 1, 16>}]} {
    %c0 = arith.constant 0 : index
    %c0_0 = arith.constant 0 : index
    %c0_1 = arith.constant 0 : index
    %0 = vector.load %arg1[%c0, %c0_0, %c0_1] : memref<2x16x256xf32, #tpu.memory_space<vmem>>, vector<2x16x256xf32>
    %1 = vector.shape_cast %0 : vector<2x16x256xf32> to vector<32x256xf32>
    %2 = arith.truncf %1 : vector<32x256xf32> to vector<32x256xbf16>
    %c0_2 = arith.constant 0 : index
    %c0_3 = arith.constant 0 : index
    %3 = vector.load %arg2[%c0_2, %c0_3] : memref<256x512xbf16, #tpu.memory_space<vmem>>, vector<256x512xbf16>
    %cst = arith.constant dense<0.000000e+00> : vector<32x512xf32>
    %4 = tpu.matmul %2, %3, %cst {dimension_numbers = #tpu.dot_dimension_numbers<[1], [0], [0], [1], [0, 0, 1, 1], [], []>} : vector<32x256xbf16>, vector<256x512xbf16>, vector<32x512xf32> -> vector<32x512xf32>
    %c0_4 = arith.constant 0 : index
    %c0_5 = arith.constant 0 : index
    %5 = vector.load %arg3[%c0_4, %c0_5] : memref<1x512xf32, #tpu.memory_space<vmem>>, vector<1x512xf32>
    %6 = vector.broadcast %5 : vector<1x512xf32> to vector<32x512xf32>
    %7 = arith.addf %4, %6 : vector<32x512xf32>
    %cst_6 = arith.constant 0.000000e+00 : f32
    %8 = vector.broadcast %cst_6 : f32 to vector<32x512xf32>
    %9 = arith.maximumf %7, %8 : vector<32x512xf32>
    %10 = arith.truncf %9 : vector<32x512xf32> to vector<32x512xbf16>
    %c0_7 = arith.constant 0 : index
    %c0_8 = arith.constant 0 : index
    %11 = vector.load %arg4[%c0_7, %c0_8] : memref<512x256xbf16, #tpu.memory_space<vmem>>, vector<512x256xbf16>
    %cst_9 = arith.constant dense<0.000000e+00> : vector<32x256xf32>
    %12 = tpu.matmul %10, %11, %cst_9 {dimension_numbers = #tpu.dot_dimension_numbers<[1], [0], [0], [1], [0, 0, 1, 1], [], []>} : vector<32x512xbf16>, vector<512x256xbf16>, vector<32x256xf32> -> vector<32x256xf32>
    %c0_10 = arith.constant 0 : index
    %c0_11 = arith.constant 0 : index
    %13 = vector.load %arg5[%c0_10, %c0_11] : memref<1x256xf32, #tpu.memory_space<vmem>>, vector<1x256xf32>
    %14 = vector.broadcast %13 : vector<1x256xf32> to vector<32x256xf32>
    %15 = arith.addf %12, %14 : vector<32x256xf32>
    %cst_12 = arith.constant 0.000000e+00 : f32
    %16 = vector.broadcast %cst_12 : f32 to vector<32x256xf32>
    %17 = arith.maximumf %15, %16 : vector<32x256xf32>
    %18 = vector.extract_strided_slice %17 {offsets = [0, 0], sizes = [16, 256], strides = [1, 1]} : vector<32x256xf32> to vector<16x256xf32>
    %19 = vector.extract_strided_slice %17 {offsets = [16, 0], sizes = [16, 256], strides = [1, 1]} : vector<32x256xf32> to vector<16x256xf32>
    %20 = arith.addf %18, %19 : vector<16x256xf32>
    %c0_13 = arith.constant 0 : index
    %c0_14 = arith.constant 0 : index
    %21 = vector.load %arg6[%c0_13, %c0_14] : memref<1x256xf32, #tpu.memory_space<vmem>>, vector<1x256xf32>
    %22 = vector.broadcast %21 : vector<1x256xf32> to vector<16x256xf32>
    %23 = arith.mulf %20, %22 : vector<16x256xf32>
    %cst_15 = arith.constant dense<0.000000e+00> : vector<16xf32>
    %24 = vector.multi_reduction <add>, %23, %cst_15 [1] : vector<16x256xf32> to vector<16xf32>
    %25 = vector.shape_cast %24 : vector<16xf32> to vector<16x1xf32>
    %c0_16 = arith.constant 0 : index
    %26 = memref.load %arg7[%c0_16] : memref<1xf32, #tpu.memory_space<smem>>
    %27 = vector.broadcast %26 : f32 to vector<16x1xf32>
    %28 = arith.addf %25, %27 : vector<16x1xf32>
    %29 = arith.negf %28 : vector<16x1xf32>
    %30 = math.exp %29 : vector<16x1xf32>
    %cst_17 = arith.constant 1.000000e+00 : f32
    %31 = vector.broadcast %cst_17 : f32 to vector<16x1xf32>
    %32 = arith.addf %31, %30 : vector<16x1xf32>
    %33 = arith.divf %31, %32 : vector<16x1xf32>
    %34 = vector.shape_cast %33 : vector<16x1xf32> to vector<1x1x16xf32>
    %c0_18 = arith.constant 0 : index
    %c0_19 = arith.constant 0 : index
    %c0_20 = arith.constant 0 : index
    %35 = vector.load %arg8[%c0_18, %c0_19, %c0_20] : memref<1x1x16xf32, #tpu.memory_space<vmem>>, vector<1x1x16xf32>
    tpu.vector_store %arg8[%c0_18, %c0_19, %c0_20], %34 {strides = array<i32>} : memref<1x1x16xf32, #tpu.memory_space<vmem>>, vector<1x1x16xf32>,
    return
  }
  func.func @transform_0(%arg0: i32) -> (i32, i32, i32) {
    %c0_i32 = arith.constant 0 : i32
    %c0_i32_0 = arith.constant 0 : i32
    %c0_i32_1 = arith.constant 0 : i32
    return %c0_i32, %arg0, %c0_i32_0 : i32, i32, i32
  }
  func.func @transform_1(%arg0: i32) -> (i32, i32) {
    %c0_i32 = arith.constant 0 : i32
    %c0_i32_0 = arith.constant 0 : i32
    %c0_i32_1 = arith.constant 0 : i32
    return %c0_i32, %c0_i32_0 : i32, i32
  }
  func.func @transform_2(%arg0: i32) -> (i32, i32) {
    %c0_i32 = arith.constant 0 : i32
    %c0_i32_0 = arith.constant 0 : i32
    %c0_i32_1 = arith.constant 0 : i32
    return %c0_i32, %c0_i32_0 : i32, i32
  }
  func.func @transform_3(%arg0: i32) -> (i32, i32) {
    %c0_i32 = arith.constant 0 : i32
    %c0_i32_0 = arith.constant 0 : i32
    %c0_i32_1 = arith.constant 0 : i32
    return %c0_i32, %c0_i32_0 : i32, i32
  }
  func.func @transform_4(%arg0: i32) -> (i32, i32) {
    %c0_i32 = arith.constant 0 : i32
    %c0_i32_0 = arith.constant 0 : i32
    %c0_i32_1 = arith.constant 0 : i32
    return %c0_i32, %c0_i32_0 : i32, i32
  }
  func.func @transform_5(%arg0: i32) -> (i32, i32) {
    %c0_i32 = arith.constant 0 : i32
    %c0_i32_0 = arith.constant 0 : i32
    %c0_i32_1 = arith.constant 0 : i32
    return %c0_i32, %c0_i32_0 : i32, i32
  }
  func.func @transform_6(%arg0: i32) -> i32 {
    %c0_i32 = arith.constant 0 : i32
    %c0_i32_0 = arith.constant 0 : i32
    return %c0_i32 : i32
  }
  func.func @transform_7(%arg0: i32) -> (i32, i32, i32) {
    %c0_i32 = arith.constant 0 : i32
    %c0_i32_0 = arith.constant 0 : i32
    %c0_i32_1 = arith.constant 0 : i32
    return %arg0, %c0_i32, %c0_i32_0 : i32, i32, i32
  }
}

</mosaic_0001>

<bundles_post_ra>
// kernel: tpu_custom_call.1
= control target key start
LH: loop header
LB: loop body
LE: loop exit
PB: predicated region body
PF: predicated region fallthrough
CT: control target
= control target key end

     0   :  { %13 = vsyncpa [#allocation4], 0  ;;  %s1808_s0 = inlined_call_operand.hbm [shape: f32[2,16,256], index: 0, kind: input, shape index: {}]   ;;  %s1809_s1 = inlined_call_operand.hbm [shape: bf16[256,512], index: 1, kind: input, shape index: {}]   ;;  %s1810_s2 = inlined_call_operand.vmem [shape: f32[1,512], index: 2, kind: input, shape index: {}]   ;;  %s1811_s3 = inlined_call_operand.hbm [shape: bf16[512,256], index: 3, kind: input, shape index: {}]   ;;  %s1812_s4 = inlined_call_operand.vmem [shape: f32[1,256], index: 4, kind: input, shape index: {}]   ;;  %s1813_s5 = inlined_call_operand.vmem [shape: f32[1,256], index: 5, kind: input, shape index: {}]   ;;  %s1814_s6 = inlined_call_operand.<no memory space> [shape: f32[1], index: 6, kind: input, shape index: {}]   ;;  %s1815_s7 = inlined_call_operand.hbm [shape: f32[1,1,16], index: 7, kind: output, shape index: {}]  }
   0x1   :  { %14 = vsyncpa [#allocation7], 0 }
   0x2   :  { %15 = vsyncpa [#allocation5], 0  ;;  %s1651_s24 = smov [#allocation6]   ;;  %s1652_s26 = smov [#allocation3]  }
   0x3   :  { %s33_s25 = sshll.u32 %s1651_s24, 4  ;;  %s21_s27 = sshll.u32 %s1652_s26, 4  ;;  %s34_s25 = int_to_ptr.vmem [resolvable:$true] %s33_s25  ;;  %s1699_s27 = int_to_ptr.vmem [resolvable:$true] %s21_s27 }
   0x4   :  { %s1557_s30 = scalar_lea.hbm %s1809_s1, 8192 }
   0x5   :  { %p1558_p0 = scmp.ne.s32.totalorder %s1809_s1, %s1557_s30  ;;  %p1561_p1 = scmp.lt.u32.totalorder %s1557_s30, %s1809_s1 }
   0x7   :  { %p1563_p2 = pnand %p1561_p1, %p1558_p0 }
   0x9   :  { %1566 = shalt.err (!%p1563_p2)
}
   0xa   :  { %s1567_s12 = scalar_lea.vmem %s34_s25, 8192  ;;  %p1572_p4 = scmp.lt.s32.totalorder %s34_s25, %s34_s25 }
   0xb   :  { %p1568_p3 = scmp.ne.s32.totalorder %s34_s25, %s1567_s12  ;;  %p1573_p5 = scmp.lt.s32.totalorder %s1567_s12, %s1567_s12 }
   0xd   :  { %p1574_p6 = por %p1573_p5, %p1572_p4 }
   0xf   :  { %p1575_p7 = pnand %p1574_p6, %p1568_p3 }
  0x11   :  { %1578 = shalt.err (!%p1575_p7)
}
  0x12   :  { %s1653_s13 = smov 256   ;;  %s1654_s14 = smov 16  }
  0x13   :  { %39 = dma.hbm_to_vmem [thread:$0]  %s1809_s1, 8192, %s34_s25, [#allocation7], %s1653_s13, %s1653_s13, %s1654_s14  }
  0x14   :  { %s1579_s19 = scalar_lea.hbm %s1808_s0, 1024 }
  0x15   :  { %p1580_p8 = scmp.ne.s32.totalorder %s1808_s0, %s1579_s19  ;;  %p1583_p9 = scmp.lt.u32.totalorder %s1579_s19, %s1808_s0 }
  0x17   :  { %p1585_p10 = pnand %p1583_p9, %p1580_p8 }
  0x19   :  { %1588 = shalt.err (!%p1585_p10)
}
  0x1a   :  { %s1589_s24 = scalar_lea.vmem %s1699_s27, 1024  ;;  %p1594_p12 = scmp.lt.s32.totalorder %s1699_s27, %s1699_s27 }
  0x1b   :  { %p1590_p11 = scmp.ne.s32.totalorder %s1699_s27, %s1589_s24  ;;  %p1595_p13 = scmp.lt.s32.totalorder %s1589_s24, %s1589_s24 }
  0x1d   :  { %p1596_p0 = por %p1595_p13, %p1594_p12 }
  0x1f   :  { %p1597_p1 = pnand %p1596_p0, %p1590_p11 }
  0x21   :  { %1600 = shalt.err (!%p1597_p1)
}
  0x22   :  { %27 = dma.hbm_to_vmem [thread:$0]  %s1808_s0, 1024, %s1699_s27, [#allocation4], %s1653_s13, %s1653_s13, %s1654_s14  }
  0x23   :  { %s1655_s26 = smov [#allocation8]   ;;  %s1601_s8 = scalar_lea.hbm %s1811_s3, 8192 }
  0x24   :  { %s47_s28 = sshll.u32 %s1655_s26, 4  ;;  %p1602_p2 = scmp.ne.s32.totalorder %s1811_s3, %s1601_s8  ;;  %s48_s28 = int_to_ptr.vmem [resolvable:$true] %s47_s28 }
  0x25   :  { %p1605_p3 = scmp.lt.u32.totalorder %s1601_s8, %s1811_s3 }
  0x27   :  { %p1607_p4 = pnand %p1605_p3, %p1602_p2 }
  0x29   :  { %1610 = shalt.err (!%p1607_p4)
}
  0x2a   :  { %s1611_s15 = scalar_lea.vmem %s48_s28, 8192  ;;  %p1616_p6 = scmp.lt.s32.totalorder %s48_s28, %s48_s28 }
  0x2b   :  { %p1612_p5 = scmp.ne.s32.totalorder %s48_s28, %s1611_s15  ;;  %p1617_p7 = scmp.lt.s32.totalorder %s1611_s15, %s1611_s15 }
  0x2d   :  { %p1618_p8 = por %p1617_p7, %p1616_p6 }
  0x2f   :  { %p1619_p9 = pnand %p1618_p8, %p1612_p5 }
  0x31   :  { %1622 = shalt.err (!%p1619_p9)
}
  0x32   :  { %s1656_s0 = smov 128   ;;  %s1657_s27 = smov 8  }
  0x33   :  { %53 = dma.hbm_to_vmem [thread:$0]  %s1811_s3, 8192, %s48_s28, [#allocation7], %s1656_s0, %s1656_s0, %s1657_s27  }
  0x34   :  { %1645 = dma.done.wait [#allocation4], 1024  }
  0x35   :  { %1646 = vsyncadd [#allocation4], 4294966272 }
  0x36   :  { %1647 = dma.done.wait [#allocation7], 16384  }
  0x37   :  { %1648 = vsyncadd [#allocation7], 4294950912  ;;  %v1357_v0 = vld [vmem:[#allocation6 + $0x4] ss:$16 sps:$4 sm:$0xff]   ;;  %v1359_v1 = vld [vmem:[#allocation6] ss:$16 sps:$4 sm:$0xff]  }
  0x38   :  { %487 = vmatprep.subr.bf16.mxu1 %v1357_v0  ;;  %v1360_v2 = vld [vmem:[#allocation6 + $0x24] ss:$16 sps:$4 sm:$0xff]   ;;  %v1362_v3 = vld [vmem:[#allocation6 + $0x20] ss:$16 sps:$4 sm:$0xff]   ;;  %v70_v13 = vld [vmem:[#allocation3 + $0x8] sm:$0xff]  ;;  %vm1182_vm0 = vcmask 130112  }
  0x39   :  { %488 = vmatpush1.bf16.msra.mxu1 %v1359_v1  ;;  %v1363_v4 = vld [vmem:[#allocation6 + $0x44] ss:$16 sps:$4 sm:$0xff]   ;;  %v1365_v5 = vld [vmem:[#allocation6 + $0x40] ss:$16 sps:$4 sm:$0xff]   ;;  %v72_v14 = vld [vmem:[#allocation3 + $0x18] sm:$0xff]  ;;  %vm1185_vm1 = vcmask 122880  }
  0x3a   :  { %489 = vmatprep.subr.bf16.mxu1 %v1360_v2  ;;  %v1366_v6 = vld [vmem:[#allocation6 + $0x64] ss:$16 sps:$4 sm:$0xff]   ;;  %v1368_v7 = vld [vmem:[#allocation6 + $0x60] ss:$16 sps:$4 sm:$0xff]   ;;  %v1742_v15 = vpack.c.bf16 %v72_v14, %v70_v13  ;;  %v1407_v46 = vld [vmem:[#allocation6 + $0xc] ss:$16 sps:$4 sm:$0xff]  }
  0x3b   :  { %v1369_v8 = vld [vmem:[#allocation6 + $0x84] ss:$16 sps:$4 sm:$0xff]   ;;  %v1371_v9 = vld [vmem:[#allocation6 + $0x80] ss:$16 sps:$4 sm:$0xff]   ;;  %v74_v47 = vld [vmem:[#allocation3 + $0x28] sm:$0xff] }
  0x3c   :  { %v1372_v10 = vld [vmem:[#allocation6 + $0xa4] ss:$16 sps:$4 sm:$0xff]   ;;  %v1374_v11 = vld [vmem:[#allocation6 + $0xa0] ss:$16 sps:$4 sm:$0xff]   ;;  %519 = vmatprep.mubr.bf16.mxu1 %v1742_v15  ;;  %v76_v48 = vld [vmem:[#allocation3 + $0x38] sm:$0xff] }
  0x3d   :  { %490 = vmatpush1.bf16.msra.mxu1 %v1362_v3  ;;  %v1375_v12 = vld [vmem:[#allocation6 + $0xc4] ss:$16 sps:$4 sm:$0xff]   ;;  %v1377_v16 = vld [vmem:[#allocation6 + $0xc0] ss:$16 sps:$4 sm:$0xff]   ;;  %v1405_v51 = vld [vmem:[#allocation6 + $0x8] ss:$16 sps:$4 sm:$0xff]   ;;  %v1747_v54 = vpack.c.bf16 %v76_v48, %v74_v47 }
  0x3e   :  { %491 = vmatprep.subr.bf16.mxu1 %v1363_v4  ;;  %v1378_v17 = vld [vmem:[#allocation6 + $0xe4] ss:$16 sps:$4 sm:$0xff]   ;;  %v1380_v18 = vld [vmem:[#allocation6 + $0xe0] ss:$16 sps:$4 sm:$0xff]   ;;  %v1410_v53 = vld [vmem:[#allocation6 + $0x2c] ss:$16 sps:$4 sm:$0xff]  }
  0x3f   :  { %v1381_v19 = vld [vmem:[#allocation6 + $0x104] ss:$16 sps:$4 sm:$0xff]   ;;  %v1383_v20 = vld [vmem:[#allocation6 + $0x100] ss:$16 sps:$4 sm:$0xff]   ;;  %v1408_v57 = vld [vmem:[#allocation6 + $0x28] ss:$16 sps:$4 sm:$0xff]  }
  0x40   :  { %v1384_v21 = vld [vmem:[#allocation6 + $0x124] ss:$16 sps:$4 sm:$0xff]   ;;  %v1386_v22 = vld [vmem:[#allocation6 + $0x120] ss:$16 sps:$4 sm:$0xff]   ;;  %v1413_v60 = vld [vmem:[#allocation6 + $0x4c] ss:$16 sps:$4 sm:$0xff]  }
  0x41   :  { %492 = vmatpush1.bf16.msra.mxu1 %v1365_v5  ;;  %v1387_v23 = vld [vmem:[#allocation6 + $0x144] ss:$16 sps:$4 sm:$0xff]   ;;  %v1389_v24 = vld [vmem:[#allocation6 + $0x140] ss:$16 sps:$4 sm:$0xff]   ;;  %v1411_v63 = vld [vmem:[#allocation6 + $0x48] ss:$16 sps:$4 sm:$0xff]  }
  0x42   :  { %493 = vmatprep.subr.bf16.mxu1 %v1366_v6  ;;  %v1390_v25 = vld [vmem:[#allocation6 + $0x164] ss:$16 sps:$4 sm:$0xff]   ;;  %v1392_v26 = vld [vmem:[#allocation6 + $0x160] ss:$16 sps:$4 sm:$0xff]   ;;  %v1416_v0 = vld [vmem:[#allocation6 + $0x6c] ss:$16 sps:$4 sm:$0xff]  }
  0x43   :  { %v1393_v27 = vld [vmem:[#allocation6 + $0x184] ss:$16 sps:$4 sm:$0xff]   ;;  %v1455_v29 = vld [vmem:[#allocation8] ss:$8 sps:$4 sm:$0xff]   ;;  %v1458_v33 = vld [vmem:[#allocation8 + $0x10] ss:$8 sps:$4 sm:$0xff]  }
  0x44   :  { %v1453_v28 = vld [vmem:[#allocation8 + $0x4] ss:$8 sps:$4 sm:$0xff]   ;;  %v1395_v30 = vld [vmem:[#allocation6 + $0x180] ss:$16 sps:$4 sm:$0xff]   ;;  %v1456_v31 = vld [vmem:[#allocation8 + $0x14] ss:$8 sps:$4 sm:$0xff]  }
  0x45   :  { %494 = vmatpush1.bf16.msra.mxu1 %v1368_v7  ;;  %v1396_v32 = vld [vmem:[#allocation6 + $0x1a4] ss:$16 sps:$4 sm:$0xff]   ;;  %1013 = vmatprep.subr.bf16.mxu0 %v1453_v28  ;;  %v1398_v35 = vld [vmem:[#allocation6 + $0x1a0] ss:$16 sps:$4 sm:$0xff]   ;;  %v1414_v4 = vld [vmem:[#allocation6 + $0x68] ss:$16 sps:$4 sm:$0xff]  }
  0x46   :  { %495 = vmatprep.subr.bf16.mxu1 %v1369_v8  ;;  %1014 = vmatpush1.bf16.msra.mxu0 %v1455_v29  ;;  %v1459_v34 = vld [vmem:[#allocation8 + $0x24] ss:$8 sps:$4 sm:$0xff]   ;;  %v1461_v37 = vld [vmem:[#allocation8 + $0x20] ss:$8 sps:$4 sm:$0xff]   ;;  %v1462_v38 = vld [vmem:[#allocation8 + $0x34] ss:$8 sps:$4 sm:$0xff]  }
  0x47   :  { %1015 = vmatprep.subr.bf16.mxu0 %v1456_v31  ;;  %v1399_v36 = vld [vmem:[#allocation6 + $0x1c4] ss:$16 sps:$4 sm:$0xff]   ;;  %v1401_v39 = vld [vmem:[#allocation6 + $0x1c0] ss:$16 sps:$4 sm:$0xff]   ;;  %v1419_v5 = vld [vmem:[#allocation6 + $0x8c] ss:$16 sps:$4 sm:$0xff]  }
  0x48   :  { %v1402_v40 = vld [vmem:[#allocation6 + $0x1e4] ss:$16 sps:$4 sm:$0xff]   ;;  %v1404_v41 = vld [vmem:[#allocation6 + $0x1e0] ss:$16 sps:$4 sm:$0xff]   ;;  %v1417_v8 = vld [vmem:[#allocation6 + $0x88] ss:$16 sps:$4 sm:$0xff]  }
  0x49   :  { %496 = vmatpush1.bf16.msra.mxu1 %v1371_v9  ;;  %v69_v42 = vld [vmem:[#allocation3] sm:$0xff]  ;;  %v1464_v43 = vld [vmem:[#allocation8 + $0x30] ss:$8 sps:$4 sm:$0xff]   ;;  %v1468_v52 = vld [vmem:[#allocation8 + $0x54] ss:$8 sps:$4 sm:$0xff]  }
  0x4a   :  { %497 = vmatprep.subr.bf16.mxu1 %v1372_v10  ;;  %1016 = vmatpush1.bf16.msra.mxu0 %v1458_v33  ;;  %v71_v44 = vld [vmem:[#allocation3 + $0x10] sm:$0xff]  ;;  %v1465_v45 = vld [vmem:[#allocation8 + $0x44] ss:$8 sps:$4 sm:$0xff]   ;;  %v1467_v49 = vld [vmem:[#allocation8 + $0x40] ss:$8 sps:$4 sm:$0xff]  }
  0x4b   :  { %1017 = vmatprep.subr.bf16.mxu0 %v1459_v34  ;;  %v1745_v50 = vpack.c.bf16 %v71_v44, %v69_v42  ;;  %v1470_v55 = vld [vmem:[#allocation8 + $0x50] ss:$8 sps:$4 sm:$0xff]   ;;  %v1471_v56 = vld [vmem:[#allocation8 + $0x64] ss:$8 sps:$4 sm:$0xff]   ;;  %v1473_v61 = vld [vmem:[#allocation8 + $0x60] ss:$8 sps:$4 sm:$0xff]  }
  0x4c   :  { %v73_v58 = vld [vmem:[#allocation3 + $0x20] sm:$0xff]  ;;  %v75_v59 = vld [vmem:[#allocation3 + $0x30] sm:$0xff]  ;;  %v1422_v9 = vld [vmem:[#allocation6 + $0xac] ss:$16 sps:$4 sm:$0xff]  }
  0x4d   :  { %498 = vmatpush1.bf16.msra.mxu1 %v1374_v11  ;;  %v1474_v62 = vld [vmem:[#allocation8 + $0x74] ss:$8 sps:$4 sm:$0xff]   ;;  %v1751_v1 = vpack.c.bf16 %v75_v59, %v73_v58  ;;  %v1476_v2 = vld [vmem:[#allocation8 + $0x70] ss:$8 sps:$4 sm:$0xff]   ;;  %v1477_v3 = vld [vmem:[#allocation8 + $0x84] ss:$8 sps:$4 sm:$0xff]  }
  0x4e   :  { %499 = vmatprep.subr.bf16.mxu1 %v1375_v12  ;;  %1018 = vmatpush1.bf16.msra.mxu0 %v1461_v37  ;;  %v1479_v6 = vld [vmem:[#allocation8 + $0x80] ss:$8 sps:$4 sm:$0xff]   ;;  %v1480_v7 = vld [vmem:[#allocation8 + $0x94] ss:$8 sps:$4 sm:$0xff]   ;;  %v1482_v10 = vld [vmem:[#allocation8 + $0x90] ss:$8 sps:$4 sm:$0xff]  }
  0x4f   :  { %1019 = vmatprep.subr.bf16.mxu0 %v1462_v38  ;;  %v1483_v11 = vld [vmem:[#allocation8 + $0xa4] ss:$8 sps:$4 sm:$0xff]   ;;  %v1420_v12 = vld [vmem:[#allocation6 + $0xa8] ss:$16 sps:$4 sm:$0xff]   ;;  %v1498_v42 = vld [vmem:[#allocation8 + $0xf4] ss:$8 sps:$4 sm:$0xff]  }
  0x50   :  { %v1425_v13 = vld [vmem:[#allocation6 + $0xcc] ss:$16 sps:$4 sm:$0xff]   ;;  %v1485_v14 = vld [vmem:[#allocation8 + $0xa0] ss:$8 sps:$4 sm:$0xff]  }
  0x51   :  { %500 = vmatpush1.bf16.msra.mxu1 %v1377_v16  ;;  %v1423_v16 = vld [vmem:[#allocation6 + $0xc8] ss:$16 sps:$4 sm:$0xff]   ;;  %v1440_v29 = vld [vmem:[#allocation6 + $0x16c] ss:$16 sps:$4 sm:$0xff]   ;;  %v1767_v48 = vld [vmem:[%s1810_s2] sm:$0xf] }
  0x52   :  { %501 = vmatprep.subr.bf16.mxu1 %v1378_v17  ;;  %1020 = vmatpush1.bf16.msra.mxu0 %v1464_v43  ;;  %v1428_v17 = vld [vmem:[#allocation6 + $0xec] ss:$16 sps:$4 sm:$0xff]   ;;  %v1435_v28 = vld [vmem:[#allocation6 + $0x148] ss:$16 sps:$4 sm:$0xff]  }
  0x53   :  { %1021 = vmatprep.subr.bf16.mxu0 %v1465_v45  ;;  %v1443_v31 = vld [vmem:[#allocation6 + $0x18c] ss:$16 sps:$4 sm:$0xff]   ;;  %v1444_v34 = vld [vmem:[#allocation6 + $0x1a8] ss:$16 sps:$4 sm:$0xff]   ;;  %v147_v45 = vlaneseq }
  0x54   :  { %v1446_v33 = vld [vmem:[#allocation6 + $0x1ac] ss:$16 sps:$4 sm:$0xff]   ;;  %v1450_v38 = vld [vmem:[#allocation6 + $0x1e8] ss:$16 sps:$4 sm:$0xff]  }
  0x55   :  { %502 = vmatpush1.bf16.msra.mxu1 %v1380_v18  ;;  %v1488_v18 = vld [vmem:[#allocation8 + $0xb0] ss:$8 sps:$4 sm:$0xff]   ;;  %v1452_v37 = vld [vmem:[#allocation6 + $0x1ec] ss:$16 sps:$4 sm:$0xff]  }
  0x56   :  { %503 = vmatprep.subr.bf16.mxu1 %v1381_v19  ;;  %1022 = vmatpush1.bf16.msra.mxu0 %v1467_v49  ;;  %v1489_v19 = vld [vmem:[#allocation8 + $0xc4] ss:$8 sps:$4 sm:$0xff]   ;;  %v1500_v43 = vld [vmem:[#allocation8 + $0xf0] ss:$8 sps:$4 sm:$0xff]  }
  0x57   :  { %1023 = vmatprep.subr.bf16.mxu0 %v1468_v52  ;;  %v1503_v44 = vld [vmem:[#allocation8 + $0x104] ss:$8 sps:$4 sm:$0xff]  }
  0x59   :  { %504 = vmatpush1.bf16.msra.mxu1 %v1383_v20  ;;  %v1426_v20 = vld [vmem:[#allocation6 + $0xe8] ss:$16 sps:$4 sm:$0xff]  }
  0x5a   :  { %505 = vmatprep.subr.bf16.mxu1 %v1384_v21  ;;  %1024 = vmatpush1.bf16.msra.mxu0 %v1470_v55  ;;  %v1431_v21 = vld [vmem:[#allocation6 + $0x10c] ss:$16 sps:$4 sm:$0xff]  }
  0x5b   :  { %1025 = vmatprep.subr.bf16.mxu0 %v1471_v56 }
  0x5d   :  { %506 = vmatpush1.bf16.msra.mxu1 %v1386_v22  ;;  %v1491_v22 = vld [vmem:[#allocation8 + $0xc0] ss:$8 sps:$4 sm:$0xff]  }
  0x5e   :  { %507 = vmatprep.subr.bf16.mxu1 %v1387_v23  ;;  %1026 = vmatpush1.bf16.msra.mxu0 %v1473_v61  ;;  %v1492_v23 = vld [vmem:[#allocation8 + $0xd4] ss:$8 sps:$4 sm:$0xff]  }
  0x5f   :  { %1027 = vmatprep.subr.bf16.mxu0 %v1474_v62 }
  0x61   :  { %508 = vmatpush1.bf16.msra.mxu1 %v1389_v24  ;;  %v1429_v24 = vld [vmem:[#allocation6 + $0x108] ss:$16 sps:$4 sm:$0xff]  }
  0x62   :  { %509 = vmatprep.subr.bf16.mxu1 %v1390_v25  ;;  %1028 = vmatpush1.bf16.msra.mxu0 %v1476_v2  ;;  %v1434_v25 = vld [vmem:[#allocation6 + $0x12c] ss:$16 sps:$4 sm:$0xff]   ;;  %v1501_v2 = vld [vmem:[#allocation8 + $0x100] ss:$8 sps:$4 sm:$0xff]  }
  0x63   :  { %1029 = vmatprep.subr.bf16.mxu0 %v1477_v3 }
  0x65   :  { %510 = vmatpush1.bf16.msra.mxu1 %v1392_v26  ;;  %v1432_v26 = vld [vmem:[#allocation6 + $0x128] ss:$16 sps:$4 sm:$0xff]  }
  0x66   :  { %511 = vmatprep.subr.bf16.mxu1 %v1393_v27  ;;  %1030 = vmatpush1.bf16.msra.mxu0 %v1479_v6  ;;  %v1437_v27 = vld [vmem:[#allocation6 + $0x14c] ss:$16 sps:$4 sm:$0xff]  }
  0x67   :  { %1031 = vmatprep.subr.bf16.mxu0 %v1480_v7 }
  0x69   :  { %512 = vmatpush1.bf16.msra.mxu1 %v1395_v30  ;;  %v1438_v30 = vld [vmem:[#allocation6 + $0x168] ss:$16 sps:$4 sm:$0xff]  }
  0x6a   :  { %513 = vmatprep.subr.bf16.mxu1 %v1396_v32  ;;  %1032 = vmatpush1.bf16.msra.mxu0 %v1482_v10  ;;  %v1441_v32 = vld [vmem:[#allocation6 + $0x188] ss:$16 sps:$4 sm:$0xff]  }
  0x6b   :  { %1033 = vmatprep.subr.bf16.mxu0 %v1483_v11 }
  0x6d   :  { %514 = vmatpush1.bf16.msra.mxu1 %v1398_v35  ;;  %v1449_v35 = vld [vmem:[#allocation6 + $0x1cc] ss:$16 sps:$4 sm:$0xff]  }
  0x6e   :  { %515 = vmatprep.subr.bf16.mxu1 %v1399_v36  ;;  %1034 = vmatpush1.bf16.msra.mxu0 %v1485_v14  ;;  %v1447_v36 = vld [vmem:[#allocation6 + $0x1c8] ss:$16 sps:$4 sm:$0xff]  }
  0x71   :  { %516 = vmatpush1.bf16.msra.mxu1 %v1401_v39  ;;  %v1494_v39 = vld [vmem:[#allocation8 + $0xd0] ss:$8 sps:$4 sm:$0xff]  }
  0x72   :  { %517 = vmatprep.subr.bf16.mxu1 %v1402_v40  ;;  %v1495_v40 = vld [vmem:[#allocation8 + $0xe4] ss:$8 sps:$4 sm:$0xff]  }
  0x75   :  { %518 = vmatpush1.bf16.msra.mxu1 %v1404_v41  ;;  %v1497_v41 = vld [vmem:[#allocation8 + $0xe0] ss:$8 sps:$4 sm:$0xff]  }
  0x76   :  { %540 = vmatprep.subr.bf16.mxu1 %v1407_v46  ;;  %v1759_v46 = vshrl.u32 %v147_v45, 7 }
  0x78   :  { %520 = vmatmul.mubr.bf16.vlgmr.msra.gmra.mrb[0].mxu1 %v1745_v50  ;;  %v1762_v47 = vsub.s32 0, %v1759_v46  ;;  %v1770_v49 = vsub.s32 1, %v1759_v46 }
  0x79   :  { %541 = vmatpush1.bf16.msra.mxu1 %v1405_v51  ;;  %529 = vmatprep.mubr.bf16.mxu1 %v1747_v54 }
  0x7a   :  { %542 = vmatprep.subr.bf16.mxu1 %v1410_v53  ;;  %v154_v51 = vrot.slane %v1767_v48, %v1770_v49 }
  0x7d   :  { %543 = vmatpush1.bf16.msra.mxu1 %v1408_v57 }
  0x7e   :  { %544 = vmatprep.subr.bf16.mxu1 %v1413_v60 }
  0x80   :  { %530 = vmatmul.mubr.bf16.gmra.mrb[4].mxu1 %v1751_v1 }
  0x81   :  { %545 = vmatpush1.bf16.msra.mxu1 %v1411_v63  ;;  %572 = vmatprep.mubr.bf16.mxu1 %v1742_v15  ;;  %v1486_v15 = vld [vmem:[#allocation8 + $0xb4] ss:$8 sps:$4 sm:$0xff]  }
  0x82   :  { %546 = vmatprep.subr.bf16.mxu1 %v1416_v0  ;;  %1035 = vmatprep.subr.bf16.mxu0 %v1486_v15  ;;  %v1509_v15 = vld [vmem:[#allocation8 + $0x124] ss:$8 sps:$4 sm:$0xff]  }
  0x83   :  { %1036 = vmatpush1.bf16.msra.mxu0 %v1488_v18 }
  0x84   :  { %1037 = vmatprep.subr.bf16.mxu0 %v1489_v19  ;;  %v1507_v19 = vld [vmem:[#allocation8 + $0x120] ss:$8 sps:$4 sm:$0xff]  }
  0x85   :  { %547 = vmatpush1.bf16.msra.mxu1 %v1414_v4  ;;  %v1506_v4 = vld [vmem:[#allocation8 + $0x114] ss:$8 sps:$4 sm:$0xff]  }
  0x86   :  { %548 = vmatprep.subr.bf16.mxu1 %v1419_v5 }
  0x87   :  { %1038 = vmatpush1.bf16.msra.mxu0 %v1491_v22  ;;  %v1510_v22 = vld [vmem:[#allocation8 + $0x130] ss:$8 sps:$4 sm:$0xff]  }
  0x88   :  { %1039 = vmatprep.subr.bf16.mxu0 %v1492_v23  ;;  %v1515_v23 = vld [vmem:[#allocation8 + $0x144] ss:$8 sps:$4 sm:$0xff]  }
  0x89   :  { %549 = vmatpush1.bf16.msra.mxu1 %v1417_v8 }
  0x8a   :  { %550 = vmatprep.subr.bf16.mxu1 %v1422_v9 }
  0x8b   :  { %1040 = vmatpush1.bf16.msra.mxu0 %v1494_v39  ;;  %v1539_v39 = vld [vmem:[#allocation8 + $0x1c4] ss:$8 sps:$4 sm:$0xff]  }
  0x8c   :  { %1041 = vmatprep.subr.bf16.mxu0 %v1495_v40  ;;  %v1537_v40 = vld [vmem:[#allocation8 + $0x1c0] ss:$8 sps:$4 sm:$0xff]  }
  0x8d   :  { %551 = vmatpush1.bf16.msra.mxu1 %v1420_v12  ;;  %v1504_v12 = vld [vmem:[#allocation8 + $0x110] ss:$8 sps:$4 sm:$0xff]  }
  0x8e   :  { %552 = vmatprep.subr.bf16.mxu1 %v1425_v13 }
  0x8f   :  { %1042 = vmatpush1.bf16.msra.mxu0 %v1497_v41  ;;  %v1542_v41 = vld [vmem:[#allocation8 + $0x1d4] ss:$8 sps:$4 sm:$0xff]  }
  0x90   :  { %1043 = vmatprep.subr.bf16.mxu0 %v1498_v42  ;;  %v157_v42 = vsub.s32 2, %v1759_v46 }
  0x91   :  { %553 = vmatpush1.bf16.msra.mxu1 %v1423_v16 }
  0x92   :  { %554 = vmatprep.subr.bf16.mxu1 %v1428_v17 }
  0x93   :  { %1044 = vmatpush1.bf16.msra.mxu0 %v1500_v43  ;;  %v161_v43 = vsub.s32 3, %v1759_v46 }
  0x94   :  { %1066 = vmatprep.subr.bf16.mxu0 %v1503_v44  ;;  %v1540_v44 = vld [vmem:[#allocation8 + $0x1d0] ss:$8 sps:$4 sm:$0xff]  }
  0x95   :  { %555 = vmatpush1.bf16.msra.mxu1 %v1426_v20 }
  0x96   :  { %556 = vmatprep.subr.bf16.mxu1 %v1431_v21  ;;  %v1512_v21 = vld [vmem:[#allocation8 + $0x134] ss:$8 sps:$4 sm:$0xff]  }
  0x99   :  { %557 = vmatpush1.bf16.msra.mxu1 %v1429_v24  ;;  %v1513_v24 = vld [vmem:[#allocation8 + $0x140] ss:$8 sps:$4 sm:$0xff]  }
  0x9a   :  { %558 = vmatprep.subr.bf16.mxu1 %v1434_v25  ;;  %v1518_v25 = vld [vmem:[#allocation8 + $0x154] ss:$8 sps:$4 sm:$0xff]  }
  0x9d   :  { %559 = vmatpush1.bf16.msra.mxu1 %v1432_v26  ;;  %v1516_v26 = vld [vmem:[#allocation8 + $0x150] ss:$8 sps:$4 sm:$0xff]  }
  0x9e   :  { %560 = vmatprep.subr.bf16.mxu1 %v1437_v27  ;;  %v1521_v27 = vld [vmem:[#allocation8 + $0x164] ss:$8 sps:$4 sm:$0xff]  }
  0xa1   :  { %561 = vmatpush1.bf16.msra.mxu1 %v1435_v28  ;;  %v1519_v28 = vld [vmem:[#allocation8 + $0x160] ss:$8 sps:$4 sm:$0xff]  }
  0xa2   :  { %562 = vmatprep.subr.bf16.mxu1 %v1440_v29  ;;  %v1524_v29 = vld [vmem:[#allocation8 + $0x174] ss:$8 sps:$4 sm:$0xff]  }
  0xa5   :  { %563 = vmatpush1.bf16.msra.mxu1 %v1438_v30  ;;  %v1522_v30 = vld [vmem:[#allocation8 + $0x170] ss:$8 sps:$4 sm:$0xff]  }
  0xa6   :  { %564 = vmatprep.subr.bf16.mxu1 %v1443_v31  ;;  %v1527_v31 = vld [vmem:[#allocation8 + $0x184] ss:$8 sps:$4 sm:$0xff]  }
  0xa9   :  { %565 = vmatpush1.bf16.msra.mxu1 %v1441_v32  ;;  %v1525_v32 = vld [vmem:[#allocation8 + $0x180] ss:$8 sps:$4 sm:$0xff]  }
  0xaa   :  { %566 = vmatprep.subr.bf16.mxu1 %v1446_v33  ;;  %v1530_v33 = vld [vmem:[#allocation8 + $0x194] ss:$8 sps:$4 sm:$0xff]  }
  0xad   :  { %567 = vmatpush1.bf16.msra.mxu1 %v1444_v34  ;;  %v1528_v34 = vld [vmem:[#allocation8 + $0x190] ss:$8 sps:$4 sm:$0xff]  }
  0xae   :  { %568 = vmatprep.subr.bf16.mxu1 %v1449_v35  ;;  %v1533_v35 = vld [vmem:[#allocation8 + $0x1a4] ss:$8 sps:$4 sm:$0xff]  }
  0xb1   :  { %569 = vmatpush1.bf16.msra.mxu1 %v1447_v36  ;;  %v1531_v36 = vld [vmem:[#allocation8 + $0x1a0] ss:$8 sps:$4 sm:$0xff]  }
  0xb2   :  { %570 = vmatprep.subr.bf16.mxu1 %v1452_v37  ;;  %v1536_v37 = vld [vmem:[#allocation8 + $0x1b4] ss:$8 sps:$4 sm:$0xff]  }
  0xb5   :  { %571 = vmatpush1.bf16.msra.mxu1 %v1450_v38  ;;  %v1534_v38 = vld [vmem:[#allocation8 + $0x1b0] ss:$8 sps:$4 sm:$0xff]  }
  0xb8   :  { %573 = vmatmul.mubr.bf16.vlgmr.msra.gmra.mrb[8].mxu1 %v1745_v50  ;;  %v150_v50 = vrot.slane %v1767_v48, %v1762_v47 }
  0xb9   :  { %582 = vmatprep.mubr.bf16.mxu1 %v1747_v54 }
  0xc0   :  { %583 = vmatmul.mubr.bf16.gmra.mrb[12].mxu1 %v1751_v1 }
 0x14b   :  { %v521_v52 = vpop.f32.mrb[0].mxu1 }
 0x14c   :  { %v522_v53 = vadd.f32 %v521_v52, %v150_v50  ;;  %v523_v54 = vpop.f32.mrb[1].mxu1  ;;  %v162_v52 = vrot.slane %v1767_v48, %v161_v43 }
 0x14d   :  { %v524_v55 = vadd.f32 %v523_v54, %v154_v51  ;;  %v525_v56 = vpop.f32.mrb[2].mxu1  ;;  %v1543_v54 = vld [vmem:[#allocation8 + $0x1e0] ss:$8 sps:$4 sm:$0xff]  }
 0x14e   :  { %v593_v57 = vmax.f32 %v522_v53, 0.0  ;;  %v526_v58 = vadd.f32 %v525_v56, %v150_v50  ;;  %v527_v59 = vpop.f32.mrb[3].mxu1 }
 0x14f   :  { %v528_v60 = vadd.f32 %v527_v59, %v154_v51  ;;  %v594_v62 = vmax.f32 %v524_v55, 0.0 }
 0x150   :  { %v597_v61 = vmax.f32 %v526_v58, 0.0 }
 0x151   :  { %v598_v63 = vmax.f32 %v528_v60, 0.0 }
 0x152   :  { %v609_v0 = vpack.c.bf16 %v597_v61, %v593_v57  ;;  %v1548_v57 = vld [vmem:[#allocation8 + $0x1f4] ss:$8 sps:$4 sm:$0xff]  }
 0x153   :  { %v610_v1 = vpack.c.bf16 %v598_v63, %v594_v62  ;;  %v531_v3 = vpop.f32.mrb[4].mxu1  ;;  %v1546_v63 = vld [vmem:[#allocation8 + $0x1f0] ss:$8 sps:$4 sm:$0xff]  }
 0x154   :  { %v532_v5 = vadd.f32 %v531_v3, %v150_v50  ;;  %v533_v6 = vpop.f32.mrb[5].mxu1 }
 0x155   :  { %1045 = vmatprep.mubr.bf16.mxu0 %v610_v1  ;;  %v534_v7 = vadd.f32 %v533_v6, %v154_v51  ;;  %v535_v8 = vpop.f32.mrb[6].mxu1 }
 0x156   :  { %1046 = vmatmul.mubr.bf16.vlgmr.msra.gmra.mrb[0].mxu0 %v609_v0  ;;  %v601_v9 = vmax.f32 %v532_v5, 0.0  ;;  %v536_v10 = vadd.f32 %v535_v8, %v150_v50  ;;  %v537_v11 = vpop.f32.mrb[7].mxu1  ;;  %v158_v50 = vrot.slane %v1767_v48, %v157_v42 }
 0x157   :  { %1067 = vmatpush1.bf16.msra.mxu0 %v1501_v2  ;;  %v602_v13 = vmax.f32 %v534_v7, 0.0  ;;  %v538_v14 = vadd.f32 %v537_v11, %v154_v51  ;;  %v1545_v51 = vld [vmem:[#allocation8 + $0x1e4] ss:$8 sps:$4 sm:$0xff]  }
 0x158   :  { %1068 = vmatprep.subr.bf16.mxu0 %v1506_v4  ;;  %v605_v16 = vmax.f32 %v536_v10, 0.0 }
 0x159   :  { %v606_v17 = vmax.f32 %v538_v14, 0.0 }
 0x15a   :  { %v613_v18 = vpack.c.bf16 %v605_v16, %v601_v9 }
 0x15b   :  { %1069 = vmatpush1.bf16.msra.mxu0 %v1504_v12  ;;  %v614_v20 = vpack.c.bf16 %v606_v17, %v602_v13 }
 0x15c   :  { %1070 = vmatprep.subr.bf16.mxu0 %v1509_v15 }
 0x15d   :  { %1055 = vmatprep.mubr.bf16.mxu0 %v614_v20 }
 0x15e   :  { %1056 = vmatmul.mubr.bf16.gmra.mrb[4].mxu0 %v613_v18 }
 0x15f   :  { %1071 = vmatpush1.bf16.msra.mxu0 %v1507_v19  ;;  %v681_v19 = vld [vmem:[%s1812_s4] sm:$0x3] }
 0x160   :  { %1072 = vmatprep.subr.bf16.mxu0 %v1512_v21 }
 0x163   :  { %1073 = vmatpush1.bf16.msra.mxu0 %v1510_v22 }
 0x164   :  { %1074 = vmatprep.subr.bf16.mxu0 %v1515_v23  ;;  %v686_v23 = vrot.slane %v681_v19, %v1762_v47 }
 0x167   :  { %1075 = vmatpush1.bf16.msra.mxu0 %v1513_v24 }
 0x168   :  { %1076 = vmatprep.subr.bf16.mxu0 %v1518_v25  ;;  %v690_v25 = vrot.slane %v681_v19, %v1770_v49 }
 0x16b   :  { %1077 = vmatpush1.bf16.msra.mxu0 %v1516_v26 }
 0x16c   :  { %1078 = vmatprep.subr.bf16.mxu0 %v1521_v27 }
 0x16f   :  { %1079 = vmatpush1.bf16.msra.mxu0 %v1519_v28 }
 0x170   :  { %1080 = vmatprep.subr.bf16.mxu0 %v1524_v29  ;;  %v1131_v29 = vld [vmem:[%s1813_s5] sm:$0x3] }
 0x173   :  { %1081 = vmatpush1.bf16.msra.mxu0 %v1522_v30 }
 0x174   :  { %1082 = vmatprep.subr.bf16.mxu0 %v1527_v31 }
 0x177   :  { %1083 = vmatpush1.bf16.msra.mxu0 %v1525_v32 }
 0x178   :  { %1084 = vmatprep.subr.bf16.mxu0 %v1530_v33 }
 0x17b   :  { %1085 = vmatpush1.bf16.msra.mxu0 %v1528_v34 }
 0x17c   :  { %1086 = vmatprep.subr.bf16.mxu0 %v1533_v35 }
 0x17f   :  { %1087 = vmatpush1.bf16.msra.mxu0 %v1531_v36 }
 0x180   :  { %1088 = vmatprep.subr.bf16.mxu0 %v1536_v37 }
 0x183   :  { %1089 = vmatpush1.bf16.msra.mxu0 %v1534_v38 }
 0x184   :  { %1090 = vmatprep.subr.bf16.mxu0 %v1539_v39 }
 0x187   :  { %1091 = vmatpush1.bf16.msra.mxu0 %v1537_v40  ;;  %v1136_v40 = vrot.slane %v1131_v29, %v1762_v47 }
 0x188   :  { %1092 = vmatprep.subr.bf16.mxu0 %v1542_v41 }
 0x18b   :  { %v574_v53 = vpop.f32.mrb[8].mxu1  ;;  %1093 = vmatpush1.bf16.msra.mxu0 %v1540_v44  ;;  %v1140_v44 = vrot.slane %v1131_v29, %v1770_v49  ;;  %v1154_v49 = vstv %s1814_s6  ;;  %s1658_s6 = smov [#allocation9]  }
 0x18c   :  { %v575_v55 = vadd.f32 %v574_v53, %v158_v50  ;;  %v576_v56 = vpop.f32.mrb[9].mxu1  ;;  %1094 = vmatprep.subr.bf16.mxu0 %v1545_v51  ;;  %s1193_s20 = sshll.u32 %s1658_s6, 4  ;;  %s1194_s20 = int_to_ptr.vmem [resolvable:$true] %s1193_s20 }
 0x18d   :  { %v577_v58 = vadd.f32 %v576_v56, %v162_v52  ;;  %v578_v59 = vpop.f32.mrb[10].mxu1  ;;  %s1623_s21 = scalar_lea.vmem %s1194_s20, 16  ;;  %s1627_s22 = scalar_lea.vmem %s1194_s20, 32 }
 0x18e   :  { %v579_v60 = vadd.f32 %v578_v59, %v158_v50  ;;  %v580_v61 = vpop.f32.mrb[11].mxu1  ;;  %v595_v0 = vmax.f32 %v575_v55, 0.0  ;;  %p1624_p10 = scmp.ne.s32.totalorder %s1194_s20, %s1623_s21  ;;  %p1628_p11 = scmp.lt.s32.totalorder %s1194_s20, %s1194_s20 }
 0x18f   :  { %v581_v62 = vadd.f32 %v580_v61, %v162_v52  ;;  %1095 = vmatpush1.bf16.msra.mxu0 %v1543_v54  ;;  %v596_v2 = vmax.f32 %v577_v58, 0.0  ;;  %p1629_p12 = scmp.lt.s32.totalorder %s1627_s22, %s1623_s21 }
 0x190   :  { %v599_v1 = vmax.f32 %v579_v60, 0.0  ;;  %1096 = vmatprep.subr.bf16.mxu0 %v1548_v57 }
 0x191   :  { %v600_v3 = vmax.f32 %v581_v62, 0.0  ;;  %p1630_p13 = por %p1629_p12, %p1628_p11 }
 0x192   :  { %v611_v48 = vpack.c.bf16 %v599_v1, %v595_v0 }
 0x193   :  { %v612_v4 = vpack.c.bf16 %v600_v3, %v596_v2  ;;  %v584_v5 = vpop.f32.mrb[12].mxu1  ;;  %1097 = vmatpush1.bf16.msra.mxu0 %v1546_v63  ;;  %p1631_p0 = pnand %p1630_p13, %p1624_p10 }
 0x194   :  { %v585_v6 = vadd.f32 %v584_v5, %v158_v50  ;;  %v586_v7 = vpop.f32.mrb[13].mxu1 }
 0x195   :  { %v587_v8 = vadd.f32 %v586_v7, %v162_v52  ;;  %v588_v9 = vpop.f32.mrb[14].mxu1  ;;  %1098 = vmatprep.mubr.bf16.mxu0 %v612_v4 }
 0x196   :  { %v589_v10 = vadd.f32 %v588_v9, %v158_v50  ;;  %v590_v11 = vpop.f32.mrb[15].mxu1  ;;  %1099 = vmatmul.mubr.bf16.vlgmr.msra.gmra.mrb[0].mxu0 %v611_v48  ;;  %v603_v13 = vmax.f32 %v585_v6, 0.0 }
 0x197   :  { %v591_v12 = vadd.f32 %v590_v11, %v162_v52  ;;  %v604_v15 = vmax.f32 %v587_v8, 0.0  ;;  %v1172_v8 = vand.u32 127, %v147_v45 }
 0x198   :  { %v607_v14 = vmax.f32 %v589_v10, 0.0 }
 0x199   :  { %v608_v16 = vmax.f32 %v591_v12, 0.0  ;;  %v1177_v9 = vadd.s32 4294967288, %v1172_v8  ;;  %v1175_v10 = vsub.s32 %v1172_v8, %v1759_v46 }
 0x19a   :  { %v615_v17 = vpack.c.bf16 %v607_v14, %v603_v13 }
 0x19b   :  { %v616_v18 = vpack.c.bf16 %v608_v16, %v604_v15  ;;  %v1180_v11 = vsub.s32 %v1177_v9, %v1759_v46 }
 0x19d   :  { %1108 = vmatprep.mubr.bf16.mxu0 %v616_v18 }
 0x19e   :  { %1109 = vmatmul.mubr.bf16.gmra.mrb[4].mxu0 %v615_v17 }
 0x269   :  { %v1100_v20 = vpop.f32.mrb[0].mxu0 }
 0x26a   :  { %v1102_v21 = vpop.f32.mrb[1].mxu0  ;;  %v1333_v26 = vadd.f32 %v1100_v20, %v686_v23 }
 0x26b   :  { %v1104_v22 = vpop.f32.mrb[2].mxu0  ;;  %v1334_v27 = vadd.f32 %v1102_v21, %v690_v25 }
 0x26c   :  { %v1106_v24 = vpop.f32.mrb[3].mxu0  ;;  %v1335_v30 = vadd.f32 %v1104_v22, %v686_v23  ;;  %v1119_v36 = vmax.f32 %v1333_v26, 0.0 }
 0x26d   :  { %v1336_v33 = vadd.f32 %v1106_v24, %v690_v25  ;;  %v1120_v41 = vmax.f32 %v1334_v27, 0.0 }
 0x26e   :  { %v1121_v50 = vmax.f32 %v1335_v30, 0.0 }
 0x26f   :  { %v1122_v53 = vmax.f32 %v1336_v33, 0.0 }
 0x271   :  { %v1110_v28 = vpop.f32.mrb[4].mxu0 }
 0x272   :  { %v1337_v31 = vadd.f32 %v1110_v28, %v686_v23  ;;  %v1112_v32 = vpop.f32.mrb[5].mxu0 }
 0x273   :  { %v1338_v34 = vadd.f32 %v1112_v32, %v690_v25  ;;  %v1114_v35 = vpop.f32.mrb[6].mxu0 }
 0x274   :  { %v1123_v37 = vmax.f32 %v1337_v31, 0.0  ;;  %v1339_v38 = vadd.f32 %v1114_v35, %v686_v23  ;;  %v1116_v39 = vpop.f32.mrb[7].mxu0 }
 0x275   :  { %v1124_v42 = vmax.f32 %v1338_v34, 0.0  ;;  %v1340_v43 = vadd.f32 %v1116_v39, %v690_v25 }
 0x276   :  { %v1127_v51 = vadd.f32 %v1123_v37, %v1119_v36  ;;  %v1125_v52 = vmax.f32 %v1339_v38, 0.0 }
 0x277   :  { %v1128_v54 = vadd.f32 %v1124_v42, %v1120_v41  ;;  %v1126_v55 = vmax.f32 %v1340_v43, 0.0 }
 0x278   :  { %v1129_v56 = vadd.f32 %v1125_v52, %v1121_v50  ;;  %v1143_v57 = vmul.f32 %v1136_v40, %v1127_v51 }
 0x279   :  { %v1130_v58 = vadd.f32 %v1126_v55, %v1122_v53  ;;  %v1144_v59 = vmul.f32 %v1140_v44, %v1128_v54 }
 0x27a   :  { %v1145_v60 = vmul.f32 %v1136_v40, %v1129_v56 }
 0x27b   :  { %v1147_v61 = vadd.f32 %v1144_v59, %v1143_v57  ;;  %v1146_v62 = vmul.f32 %v1140_v44, %v1130_v58 }
 0x27d   :  { %1148 = vadd.xlane.f32.xlu0 %v1147_v61  ;;  %v1150_v47 = vadd.f32 %v1146_v62, %v1145_v60 }
 0x281   :  { %1151 = vadd.xlane.f32.xlu0 %v1150_v47 }
 0x30a   :  { %v1149_v63 = vpop.xlane.xlu0 %1148 }
 0x30b   :  { %v1155_v0 = vadd.f32 %v1154_v49, %v1149_v63 }
 0x30d   :  { %v1331_v1 = vmul.f32 -1.442695, %v1155_v0 }
 0x30e   :  { %v1152_v2 = vpop.xlane.xlu0 %1151 }
 0x30f   :  { %1549 = vpow2.f32 %v1331_v1  ;;  %v1156_v3 = vadd.f32 %v1154_v49, %v1152_v2 }
 0x311   :  { %v1332_v48 = vmul.f32 -1.442695, %v1156_v3 }
 0x313   :  { %1551 = vpow2.f32 %v1332_v48 }
 0x319   :  { %v1550_v4 = vpop.eup %1549 }
 0x31a   :  { %v1163_v5 = vadd.f32 1.0, %v1550_v4 }
 0x31c   :  { %1553 = vrcp.f32 %v1163_v5 }
 0x31d   :  { %v1552_v6 = vpop.eup %1551 }
 0x31e   :  { %v1164_v7 = vadd.f32 1.0, %v1552_v6 }
 0x320   :  { %1555 = vrcp.f32 %v1164_v7 }
 0x326   :  { %v1554_v12 = vpop.eup %1553 }
 0x327   :  { %v1176_v14 = vrot.slane %v1554_v12, %v1175_v10 }
 0x32a   :  { %v1556_v13 = vpop.eup %1555 }
 0x32b   :  { %v1181_v15 = vrot.slane %v1556_v13, %v1180_v11 }
 0x32d   :  { %v1183_v16 = vsel %vm1182_vm0, %v1181_v15, %v1176_v14 }
 0x32e   :  { %1186 = vst.msk [vmem:[#allocation9] sm:$0x1] %vm1185_vm1, %v1183_v16 }
 0x32f   :  { %1634 = shalt.err (!%p1631_p0)
}
 0x330   :  { %s1635_s1 = scalar_lea.hbm %s1815_s7, 16 }
 0x331   :  { %p1636_p1 = scmp.ne.s32.totalorder %s1815_s7, %s1635_s1  ;;  %p1639_p2 = scmp.lt.u32.totalorder %s1635_s1, %s1815_s7 }
 0x333   :  { %p1641_p3 = pnand %p1639_p2, %p1636_p1 }
 0x335   :  { %1644 = shalt.err (!%p1641_p3)
}
 0x336   :  { %1196 = dma.vmem_to_hbm [thread:$0]  %s1194_s20, 16, %s1815_s7, [#allocation5]  }
 0x337   :  { %1649 = dma.done.wait [#allocation5], 16  }
 0x338   :  { %1650 = vsyncadd [#allocation5], 4294967280 }
 0x339   :  { %1200 = vsyncpa [#allocation4], 1 }
 0x33a   :  { %1201 = vsyncpa [#allocation7], 1 }
 0x33b   :  { %1202 = vsyncpa [#allocation5], 1 }

// kernel: tpu_custom_call.1
= control target key start
LH: loop header
LB: loop body
LE: loop exit
PB: predicated region body
PF: predicated region fallthrough
CT: control target
= control target key end

     0   :  { %13 = vsyncpa [#allocation4], 0  ;;  %s1808_s0 = inlined_call_operand.hbm [shape: f32[2,16,256], index: 0, kind: input, shape index: {}]   ;;  %s1809_s1 = inlined_call_operand.hbm [shape: bf16[256,512], index: 1, kind: input, shape index: {}]   ;;  %s1810_s2 = inlined_call_operand.vmem [shape: f32[1,512], index: 2, kind: input, shape index: {}]   ;;  %s1811_s3 = inlined_call_operand.hbm [shape: bf16[512,256], index: 3, kind: input, shape index: {}]   ;;  %s1812_s4 = inlined_call_operand.vmem [shape: f32[1,256], index: 4, kind: input, shape index: {}]   ;;  %s1813_s5 = inlined_call_operand.vmem [shape: f32[1,256], index: 5, kind: input, shape index: {}]   ;;  %s1814_s6 = inlined_call_operand.<no memory space> [shape: f32[1], index: 6, kind: input, shape index: {}]   ;;  %s1815_s7 = inlined_call_operand.hbm [shape: f32[1,1,16], index: 7, kind: output, shape index: {}]  }
   0x1   :  { %14 = vsyncpa [#allocation7], 0 }
   0x2   :  { %15 = vsyncpa [#allocation5], 0  ;;  %s1651_s24 = smov [#allocation6]   ;;  %s1652_s26 = smov [#allocation3]  }
   0x3   :  { %s33_s25 = sshll.u32 %s1651_s24, 4  ;;  %s21_s27 = sshll.u32 %s1652_s26, 4  ;;  %s34_s25 = int_to_ptr.vmem [resolvable:$true] %s33_s25  ;;  %s1699_s27 = int_to_ptr.vmem [resolvable:$true] %s21_s27 }
   0x4   :  { %s1557_s30 = scalar_lea.hbm %s1809_s1, 8192 }
   0x5   :  { %p1558_p0 = scmp.ne.s32.totalorder %s1809_s1, %s1557_s30  ;;  %p1561_p1 = scmp.lt.u32.totalorder %s1557_s30, %s1809_s1 }
   0x7   :  { %p1563_p2 = pnand %p1561_p1, %p1558_p0 }
   0x9   :  { %1566 = shalt.err (!%p1563_p2)
}
   0xa   :  { %s1567_s12 = scalar_lea.vmem %s34_s25, 8192  ;;  %p1572_p4 = scmp.lt.s32.totalorder %s34_s25, %s34_s25 }
   0xb   :  { %p1568_p3 = scmp.ne.s32.totalorder %s34_s25, %s1567_s12  ;;  %p1573_p5 = scmp.lt.s32.totalorder %s1567_s12, %s1567_s12 }
   0xd   :  { %p1574_p6 = por %p1573_p5, %p1572_p4 }
   0xf   :  { %p1575_p7 = pnand %p1574_p6, %p1568_p3 }
  0x11   :  { %1578 = shalt.err (!%p1575_p7)
}
  0x12   :  { %s1653_s13 = smov 256   ;;  %s1654_s14 = smov 16  }
  0x13   :  { %39 = dma.hbm_to_vmem [thread:$0]  %s1809_s1, 8192, %s34_s25, [#allocation7], %s1653_s13, %s1653_s13, %s1654_s14  }
  0x14   :  { %s1579_s19 = scalar_lea.hbm %s1808_s0, 1024 }
  0x15   :  { %p1580_p8 = scmp.ne.s32.totalorder %s1808_s0, %s1579_s19  ;;  %p1583_p9 = scmp.lt.u32.totalorder %s1579_s19, %s1808_s0 }
  0x17   :  { %p1585_p10 = pnand %p1583_p9, %p1580_p8 }
  0x19   :  { %1588 = shalt.err (!%p1585_p10)
}
  0x1a   :  { %s1589_s24 = scalar_lea.vmem %s1699_s27, 1024  ;;  %p1594_p12 = scmp.lt.s32.totalorder %s1699_s27, %s1699_s27 }
  0x1b   :  { %p1590_p11 = scmp.ne.s32.totalorder %s1699_s27, %s1589_s24  ;;  %p1595_p13 = scmp.lt.s32.totalorder %s1589_s24, %s1589_s24 }
  0x1d   :  { %p1596_p0 = por %p1595_p13, %p1594_p12 }
  0x1f   :  { %p1597_p1 = pnand %p1596_p0, %p1590_p11 }
  0x21   :  { %1600 = shalt.err (!%p1597_p1)
}
  0x22   :  { %27 = dma.hbm_to_vmem [thread:$0]  %s1808_s0, 1024, %s1699_s27, [#allocation4], %s1653_s13, %s1653_s13, %s1654_s14  }
  0x23   :  { %s1655_s26 = smov [#allocation8]   ;;  %s1601_s8 = scalar_lea.hbm %s1811_s3, 8192 }
  0x24   :  { %s47_s28 = sshll.u32 %s1655_s26, 4  ;;  %p1602_p2 = scmp.ne.s32.totalorder %s1811_s3, %s1601_s8  ;;  %s48_s28 = int_to_ptr.vmem [resolvable:$true] %s47_s28 }
  0x25   :  { %p1605_p3 = scmp.lt.u32.totalorder %s1601_s8, %s1811_s3 }
  0x27   :  { %p1607_p4 = pnand %p1605_p3, %p1602_p2 }
  0x29   :  { %1610 = shalt.err (!%p1607_p4)
}
  0x2a   :  { %s1611_s15 = scalar_lea.vmem %s48_s28, 8192  ;;  %p1616_p6 = scmp.lt.s32.totalorder %s48_s28, %s48_s28 }
  0x2b   :  { %p1612_p5 = scmp.ne.s32.totalorder %s48_s28, %s1611_s15  ;;  %p1617_p7 = scmp.lt.s32.totalorder %s1611_s15, %s1611_s15 }
  0x2d   :  { %p1618_p8 = por %p1617_p7, %p1616_p6 }
  0x2f   :  { %p1619_p9 = pnand %p1618_p8, %p1612_p5 }
  0x31   :  { %1622 = shalt.err (!%p1619_p9)
}
  0x32   :  { %s1656_s0 = smov 128   ;;  %s1657_s27 = smov 8  }
  0x33   :  { %53 = dma.hbm_to_vmem [thread:$0]  %s1811_s3, 8192, %s48_s28, [#allocation7], %s1656_s0, %s1656_s0, %s1657_s27  }
  0x34   :  { %1645 = dma.done.wait [#allocation4], 1024  }
  0x35   :  { %1646 = vsyncadd [#allocation4], 4294966272 }
  0x36   :  { %1647 = dma.done.wait [#allocation7], 16384  }
  0x37   :  { %1648 = vsyncadd [#allocation7], 4294950912  ;;  %v1357_v0 = vld [vmem:[#allocation6 + $0x4] ss:$16 sps:$4 sm:$0xff]   ;;  %v1359_v1 = vld [vmem:[#allocation6] ss:$16 sps:$4 sm:$0xff]  }
  0x38   :  { %487 = vmatprep.subr.bf16.mxu1 %v1357_v0  ;;  %v1360_v2 = vld [vmem:[#allocation6 + $0x24] ss:$16 sps:$4 sm:$0xff]   ;;  %v1362_v3 = vld [vmem:[#allocation6 + $0x20] ss:$16 sps:$4 sm:$0xff]   ;;  %v70_v13 = vld [vmem:[#allocation3 + $0x8] sm:$0xff]  ;;  %vm1182_vm0 = vcmask 130112  }
  0x39   :  { %488 = vmatpush1.bf16.msra.mxu1 %v1359_v1  ;;  %v1363_v4 = vld [vmem:[#allocation6 + $0x44] ss:$16 sps:$4 sm:$0xff]   ;;  %v1365_v5 = vld [vmem:[#allocation6 + $0x40] ss:$16 sps:$4 sm:$0xff]   ;;  %v72_v14 = vld [vmem:[#allocation3 + $0x18] sm:$0xff]  ;;  %vm1185_vm1 = vcmask 122880  }
  0x3a   :  { %489 = vmatprep.subr.bf16.mxu1 %v1360_v2  ;;  %v1366_v6 = vld [vmem:[#allocation6 + $0x64] ss:$16 sps:$4 sm:$0xff]   ;;  %v1368_v7 = vld [vmem:[#allocation6 + $0x60] ss:$16 sps:$4 sm:$0xff]   ;;  %v1742_v15 = vpack.c.bf16 %v72_v14, %v70_v13  ;;  %v1407_v46 = vld [vmem:[#allocation6 + $0xc] ss:$16 sps:$4 sm:$0xff]  }
  0x3b   :  { %v1369_v8 = vld [vmem:[#allocation6 + $0x84] ss:$16 sps:$4 sm:$0xff]   ;;  %v1371_v9 = vld [vmem:[#allocation6 + $0x80] ss:$16 sps:$4 sm:$0xff]   ;;  %v74_v47 = vld [vmem:[#allocation3 + $0x28] sm:$0xff] }
  0x3c   :  { %v1372_v10 = vld [vmem:[#allocation6 + $0xa4] ss:$16 sps:$4 sm:$0xff]   ;;  %v1374_v11 = vld [vmem:[#allocation6 + $0xa0] ss:$16 sps:$4 sm:$0xff]   ;;  %519 = vmatprep.mubr.bf16.mxu1 %v1742_v15  ;;  %v76_v48 = vld [vmem:[#allocation3 + $0x38] sm:$0xff] }
  0x3d   :  { %490 = vmatpush1.bf16.msra.mxu1 %v1362_v3  ;;  %v1375_v12 = vld [vmem:[#allocation6 + $0xc4] ss:$16 sps:$4 sm:$0xff]   ;;  %v1377_v16 = vld [vmem:[#allocation6 + $0xc0] ss:$16 sps:$4 sm:$0xff]   ;;  %v1405_v51 = vld [vmem:[#allocation6 + $0x8] ss:$16 sps:$4 sm:$0xff]   ;;  %v1747_v54 = vpack.c.bf16 %v76_v48, %v74_v47 }
  0x3e   :  { %491 = vmatprep.subr.bf16.mxu1 %v1363_v4  ;;  %v1378_v17 = vld [vmem:[#allocation6 + $0xe4] ss:$16 sps:$4 sm:$0xff]   ;;  %v1380_v18 = vld [vmem:[#allocation6 + $0xe0] ss:$16 sps:$4 sm:$0xff]   ;;  %v1410_v53 = vld [vmem:[#allocation6 + $0x2c] ss:$16 sps:$4 sm:$0xff]  }
  0x3f   :  { %v1381_v19 = vld [vmem:[#allocation6 + $0x104] ss:$16 sps:$4 sm:$0xff]   ;;  %v1383_v20 = vld [vmem:[#allocation6 + $0x100] ss:$16 sps:$4 sm:$0xff]   ;;  %v1408_v57 = vld [vmem:[#allocation6 + $0x28] ss:$16 sps:$4 sm:$0xff]  }
  0x40   :  { %v1384_v21 = vld [vmem:[#allocation6 + $0x124] ss:$16 sps:$4 sm:$0xff]   ;;  %v1386_v22 = vld [vmem:[#allocation6 + $0x120] ss:$16 sps:$4 sm:$0xff]   ;;  %v1413_v60 = vld [vmem:[#allocation6 + $0x4c] ss:$16 sps:$4 sm:$0xff]  }
  0x41   :  { %492 = vmatpush1.bf16.msra.mxu1 %v1365_v5  ;;  %v1387_v23 = vld [vmem:[#allocation6 + $0x144] ss:$16 sps:$4 sm:$0xff]   ;;  %v1389_v24 = vld [vmem:[#allocation6 + $0x140] ss:$16 sps:$4 sm:$0xff]   ;;  %v1411_v63 = vld [vmem:[#allocation6 + $0x48] ss:$16 sps:$4 sm:$0xff]  }
  0x42   :  { %493 = vmatprep.subr.bf16.mxu1 %v1366_v6  ;;  %v1390_v25 = vld [vmem:[#allocation6 + $0x164] ss:$16 sps:$4 sm:$0xff]   ;;  %v1392_v26 = vld [vmem:[#allocation6 + $0x160] ss:$16 sps:$4 sm:$0xff]   ;;  %v1416_v0 = vld [vmem:[#allocation6 + $0x6c] ss:$16 sps:$4 sm:$0xff]  }
  0x43   :  { %v1393_v27 = vld [vmem:[#allocation6 + $0x184] ss:$16 sps:$4 sm:$0xff]   ;;  %v1455_v29 = vld [vmem:[#allocation8] ss:$8 sps:$4 sm:$0xff]   ;;  %v1458_v33 = vld [vmem:[#allocation8 + $0x10] ss:$8 sps:$4 sm:$0xff]  }
  0x44   :  { %v1453_v28 = vld [vmem:[#allocation8 + $0x4] ss:$8 sps:$4 sm:$0xff]   ;;  %v1395_v30 = vld [vmem:[#allocation6 + $0x180] ss:$16 sps:$4 sm:$0xff]   ;;  %v1456_v31 = vld [vmem:[#allocation8 + $0x14] ss:$8 sps:$4 sm:$0xff]  }
  0x45   :  { %494 = vmatpush1.bf16.msra.mxu1 %v1368_v7  ;;  %v1396_v32 = vld [vmem:[#allocation6 + $0x1a4] ss:$16 sps:$4 sm:$0xff]   ;;  %1013 = vmatprep.subr.bf16.mxu0 %v1453_v28  ;;  %v1398_v35 = vld [vmem:[#allocation6 + $0x1a0] ss:$16 sps:$4 sm:$0xff]   ;;  %v1414_v4 = vld [vmem:[#allocation6 + $0x68] ss:$16 sps:$4 sm:$0xff]  }
  0x46   :  { %495 = vmatprep.subr.bf16.mxu1 %v1369_v8  ;;  %1014 = vmatpush1.bf16.msra.mxu0 %v1455_v29  ;;  %v1459_v34 = vld [vmem:[#allocation8 + $0x24] ss:$8 sps:$4 sm:$0xff]   ;;  %v1461_v37 = vld [vmem:[#allocation8 + $0x20] ss:$8 sps:$4 sm:$0xff]   ;;  %v1462_v38 = vld [vmem:[#allocation8 + $0x34] ss:$8 sps:$4 sm:$0xff]  }
  0x47   :  { %1015 = vmatprep.subr.bf16.mxu0 %v1456_v31  ;;  %v1399_v36 = vld [vmem:[#allocation6 + $0x1c4] ss:$16 sps:$4 sm:$0xff]   ;;  %v1401_v39 = vld [vmem:[#allocation6 + $0x1c0] ss:$16 sps:$4 sm:$0xff]   ;;  %v1419_v5 = vld [vmem:[#allocation6 + $0x8c] ss:$16 sps:$4 sm:$0xff]  }
  0x48   :  { %v1402_v40 = vld [vmem:[#allocation6 + $0x1e4] ss:$16 sps:$4 sm:$0xff]   ;;  %v1404_v41 = vld [vmem:[#allocation6 + $0x1e0] ss:$16 sps:$4 sm:$0xff]   ;;  %v1417_v8 = vld [vmem:[#allocation6 + $0x88] ss:$16 sps:$4 sm:$0xff]  }
  0x49   :  { %496 = vmatpush1.bf16.msra.mxu1 %v1371_v9  ;;  %v69_v42 = vld [vmem:[#allocation3] sm:$0xff]  ;;  %v1464_v43 = vld [vmem:[#allocation8 + $0x30] ss:$8 sps:$4 sm:$0xff]   ;;  %v1468_v52 = vld [vmem:[#allocation8 + $0x54] ss:$8 sps:$4 sm:$0xff]  }
  0x4a   :  { %497 = vmatprep.subr.bf16.mxu1 %v1372_v10  ;;  %1016 = vmatpush1.bf16.msra.mxu0 %v1458_v33  ;;  %v71_v44 = vld [vmem:[#allocation3 + $0x10] sm:$0xff]  ;;  %v1465_v45 = vld [vmem:[#allocation8 + $0x44] ss:$8 sps:$4 sm:$0xff]   ;;  %v1467_v49 = vld [vmem:[#allocation8 + $0x40] ss:$8 sps:$4 sm:$0xff]  }
  0x4b   :  { %1017 = vmatprep.subr.bf16.mxu0 %v1459_v34  ;;  %v1745_v50 = vpack.c.bf16 %v71_v44, %v69_v42  ;;  %v1470_v55 = vld [vmem:[#allocation8 + $0x50] ss:$8 sps:$4 sm:$0xff]   ;;  %v1471_v56 = vld [vmem:[#allocation8 + $0x64] ss:$8 sps:$4 sm:$0xff]   ;;  %v1473_v61 = vld [vmem:[#allocation8 + $0x60] ss:$8 sps:$4 sm:$0xff]  }
  0x4c   :  { %v73_v58 = vld [vmem:[#allocation3 + $0x20] sm:$0xff]  ;;  %v75_v59 = vld [vmem:[#allocation3 + $0x30] sm:$0xff]  ;;  %v1422_v9 = vld [vmem:[#allocation6 + $0xac] ss:$16 sps:$4 sm:$0xff]  }
  0x4d   :  { %498 = vmatpush1.bf16.msra.mxu1 %v1374_v11  ;;  %v1474_v62 = vld [vmem:[#allocation8 + $0x74] ss:$8 sps:$4 sm:$0xff]   ;;  %v1751_v1 = vpack.c.bf16 %v75_v59, %v73_v58  ;;  %v1476_v2 = vld [vmem:[#allocation8 + $0x70] ss:$8 sps:$4 sm:$0xff]   ;;  %v1477_v3 = vld [vmem:[#allocation8 + $0x84] ss:$8 sps:$4 sm:$0xff]  }
  0x4e   :  { %499 = vmatprep.subr.bf16.mxu1 %v1375_v12  ;;  %1018 = vmatpush1.bf16.msra.mxu0 %v1461_v37  ;;  %v1479_v6 = vld [vmem:[#allocation8 + $0x80] ss:$8 sps:$4 sm:$0xff]   ;;  %v1480_v7 = vld [vmem:[#allocation8 + $0x94] ss:$8 sps:$4 sm:$0xff]   ;;  %v1482_v10 = vld [vmem:[#allocation8 + $0x90] ss:$8 sps:$4 sm:$0xff]  }
  0x4f   :  { %1019 = vmatprep.subr.bf16.mxu0 %v1462_v38  ;;  %v1483_v11 = vld [vmem:[#allocation8 + $0xa4] ss:$8 sps:$4 sm:$0xff]   ;;  %v1420_v12 = vld [vmem:[#allocation6 + $0xa8] ss:$16 sps:$4 sm:$0xff]   ;;  %v1498_v42 = vld [vmem:[#allocation8 + $0xf4] ss:$8 sps:$4 sm:$0xff]  }
  0x50   :  { %v1425_v13 = vld [vmem:[#allocation6 + $0xcc] ss:$16 sps:$4 sm:$0xff]   ;;  %v1485_v14 = vld [vmem:[#allocation8 + $0xa0] ss:$8 sps:$4 sm:$0xff]  }
  0x51   :  { %500 = vmatpush1.bf16.msra.mxu1 %v1377_v16  ;;  %v1423_v16 = vld [vmem:[#allocation6 + $0xc8] ss:$16 sps:$4 sm:$0xff]   ;;  %v1440_v29 = vld [vmem:[#allocation6 + $0x16c] ss:$16 sps:$4 sm:$0xff]   ;;  %v1767_v48 = vld [vmem:[%s1810_s2] sm:$0xf] }
  0x52   :  { %501 = vmatprep.subr.bf16.mxu1 %v1378_v17  ;;  %1020 = vmatpush1.bf16.msra.mxu0 %v1464_v43  ;;  %v1428_v17 = vld [vmem:[#allocation6 + $0xec] ss:$16 sps:$4 sm:$0xff]   ;;  %v1435_v28 = vld [vmem:[#allocation6 + $0x148] ss:$16 sps:$4 sm:$0xff]  }
  0x53   :  { %1021 = vmatprep.subr.bf16.mxu0 %v1465_v45  ;;  %v1443_v31 = vld [vmem:[#allocation6 + $0x18c] ss:$16 sps:$4 sm:$0xff]   ;;  %v1444_v34 = vld [vmem:[#allocation6 + $0x1a8] ss:$16 sps:$4 sm:$0xff]   ;;  %v147_v45 = vlaneseq }
  0x54   :  { %v1446_v33 = vld [vmem:[#allocation6 + $0x1ac] ss:$16 sps:$4 sm:$0xff]   ;;  %v1450_v38 = vld [vmem:[#allocation6 + $0x1e8] ss:$16 sps:$4 sm:$0xff]  }
  0x55   :  { %502 = vmatpush1.bf16.msra.mxu1 %v1380_v18  ;;  %v1488_v18 = vld [vmem:[#allocation8 + $0xb0] ss:$8 sps:$4 sm:$0xff]   ;;  %v1452_v37 = vld [vmem:[#allocation6 + $0x1ec] ss:$16 sps:$4 sm:$0xff]  }
  0x56   :  { %503 = vmatprep.subr.bf16.mxu1 %v1381_v19  ;;  %1022 = vmatpush1.bf16.msra.mxu0 %v1467_v49  ;;  %v1489_v19 = vld [vmem:[#allocation8 + $0xc4] ss:$8 sps:$4 sm:$0xff]   ;;  %v1500_v43 = vld [vmem:[#allocation8 + $0xf0] ss:$8 sps:$4 sm:$0xff]  }
  0x57   :  { %1023 = vmatprep.subr.bf16.mxu0 %v1468_v52  ;;  %v1503_v44 = vld [vmem:[#allocation8 + $0x104] ss:$8 sps:$4 sm:$0xff]  }
  0x59   :  { %504 = vmatpush1.bf16.msra.mxu1 %v1383_v20  ;;  %v1426_v20 = vld [vmem:[#allocation6 + $0xe8] ss:$16 sps:$4 sm:$0xff]  }
  0x5a   :  { %505 = vmatprep.subr.bf16.mxu1 %v1384_v21  ;;  %1024 = vmatpush1.bf16.msra.mxu0 %v1470_v55  ;;  %v1431_v21 = vld [vmem:[#allocation6 + $0x10c] ss:$16 sps:$4 sm:$0xff]  }
  0x5b   :  { %1025 = vmatprep.subr.bf16.mxu0 %v1471_v56 }
  0x5d   :  { %506 = vmatpush1.bf16.msra.mxu1 %v1386_v22  ;;  %v1491_v22 = vld [vmem:[#allocation8 + $0xc0] ss:$8 sps:$4 sm:$0xff]  }
  0x5e   :  { %507 = vmatprep.subr.bf16.mxu1 %v1387_v23  ;;  %1026 = vmatpush1.bf16.msra.mxu0 %v1473_v61  ;;  %v1492_v23 = vld [vmem:[#allocation8 + $0xd4] ss:$8 sps:$4 sm:$0xff]  }
  0x5f   :  { %1027 = vmatprep.subr.bf16.mxu0 %v1474_v62 }
  0x61   :  { %508 = vmatpush1.bf16.msra.mxu1 %v1389_v24  ;;  %v1429_v24 = vld [vmem:[#allocation6 + $0x108] ss:$16 sps:$4 sm:$0xff]  }
  0x62   :  { %509 = vmatprep.subr.bf16.mxu1 %v1390_v25  ;;  %1028 = vmatpush1.bf16.msra.mxu0 %v1476_v2  ;;  %v1434_v25 = vld [vmem:[#allocation6 + $0x12c] ss:$16 sps:$4 sm:$0xff]   ;;  %v1501_v2 = vld [vmem:[#allocation8 + $0x100] ss:$8 sps:$4 sm:$0xff]  }
  0x63   :  { %1029 = vmatprep.subr.bf16.mxu0 %v1477_v3 }
  0x65   :  { %510 = vmatpush1.bf16.msra.mxu1 %v1392_v26  ;;  %v1432_v26 = vld [vmem:[#allocation6 + $0x128] ss:$16 sps:$4 sm:$0xff]  }
  0x66   :  { %511 = vmatprep.subr.bf16.mxu1 %v1393_v27  ;;  %1030 = vmatpush1.bf16.msra.mxu0 %v1479_v6  ;;  %v1437_v27 = vld [vmem:[#allocation6 + $0x14c] ss:$16 sps:$4 sm:$0xff]  }
  0x67   :  { %1031 = vmatprep.subr.bf16.mxu0 %v1480_v7 }
  0x69   :  { %512 = vmatpush1.bf16.msra.mxu1 %v1395_v30  ;;  %v1438_v30 = vld [vmem:[#allocation6 + $0x168] ss:$16 sps:$4 sm:$0xff]  }
  0x6a   :  { %513 = vmatprep.subr.bf16.mxu1 %v1396_v32  ;;  %1032 = vmatpush1.bf16.msra.mxu0 %v1482_v10  ;;  %v1441_v32 = vld [vmem:[#allocation6 + $0x188] ss:$16 sps:$4 sm:$0xff]  }
  0x6b   :  { %1033 = vmatprep.subr.bf16.mxu0 %v1483_v11 }
  0x6d   :  { %514 = vmatpush1.bf16.msra.mxu1 %v1398_v35  ;;  %v1449_v35 = vld [vmem:[#allocation6 + $0x1cc] ss:$16 sps:$4 sm:$0xff]  }
  0x6e   :  { %515 = vmatprep.subr.bf16.mxu1 %v1399_v36  ;;  %1034 = vmatpush1.bf16.msra.mxu0 %v1485_v14  ;;  %v1447_v36 = vld [vmem:[#allocation6 + $0x1c8] ss:$16 sps:$4 sm:$0xff]  }
  0x71   :  { %516 = vmatpush1.bf16.msra.mxu1 %v1401_v39  ;;  %v1494_v39 = vld [vmem:[#allocation8 + $0xd0] ss:$8 sps:$4 sm:$0xff]  }
  0x72   :  { %517 = vmatprep.subr.bf16.mxu1 %v1402_v40  ;;  %v1495_v40 = vld [vmem:[#allocation8 + $0xe4] ss:$8 sps:$4 sm:$0xff]  }
  0x75   :  { %518 = vmatpush1.bf16.msra.mxu1 %v1404_v41  ;;  %v1497_v41 = vld [vmem:[#allocation8 + $0xe0] ss:$8 sps:$4 sm:$0xff]  }
  0x76   :  { %540 = vmatprep.subr.bf16.mxu1 %v1407_v46  ;;  %v1759_v46 = vshrl.u32 %v147_v45, 7 }
  0x78   :  { %520 = vmatmul.mubr.bf16.vlgmr.msra.gmra.mrb[0].mxu1 %v1745_v50  ;;  %v1762_v47 = vsub.s32 0, %v1759_v46  ;;  %v1770_v49 = vsub.s32 1, %v1759_v46 }
  0x79   :  { %541 = vmatpush1.bf16.msra.mxu1 %v1405_v51  ;;  %529 = vmatprep.mubr.bf16.mxu1 %v1747_v54 }
  0x7a   :  { %542 = vmatprep.subr.bf16.mxu1 %v1410_v53  ;;  %v154_v51 = vrot.slane %v1767_v48, %v1770_v49 }
  0x7d   :  { %543 = vmatpush1.bf16.msra.mxu1 %v1408_v57 }
  0x7e   :  { %544 = vmatprep.subr.bf16.mxu1 %v1413_v60 }
  0x80   :  { %530 = vmatmul.mubr.bf16.gmra.mrb[4].mxu1 %v1751_v1 }
  0x81   :  { %545 = vmatpush1.bf16.msra.mxu1 %v1411_v63  ;;  %572 = vmatprep.mubr.bf16.mxu1 %v1742_v15  ;;  %v1486_v15 = vld [vmem:[#allocation8 + $0xb4] ss:$8 sps:$4 sm:$0xff]  }
  0x82   :  { %546 = vmatprep.subr.bf16.mxu1 %v1416_v0  ;;  %1035 = vmatprep.subr.bf16.mxu0 %v1486_v15  ;;  %v1509_v15 = vld [vmem:[#allocation8 + $0x124] ss:$8 sps:$4 sm:$0xff]  }
  0x83   :  { %1036 = vmatpush1.bf16.msra.mxu0 %v1488_v18 }
  0x84   :  { %1037 = vmatprep.subr.bf16.mxu0 %v1489_v19  ;;  %v1507_v19 = vld [vmem:[#allocation8 + $0x120] ss:$8 sps:$4 sm:$0xff]  }
  0x85   :  { %547 = vmatpush1.bf16.msra.mxu1 %v1414_v4  ;;  %v1506_v4 = vld [vmem:[#allocation8 + $0x114] ss:$8 sps:$4 sm:$0xff]  }
  0x86   :  { %548 = vmatprep.subr.bf16.mxu1 %v1419_v5 }
  0x87   :  { %1038 = vmatpush1.bf16.msra.mxu0 %v1491_v22  ;;  %v1510_v22 = vld [vmem:[#allocation8 + $0x130] ss:$8 sps:$4 sm:$0xff]  }
  0x88   :  { %1039 = vmatprep.subr.bf16.mxu0 %v1492_v23  ;;  %v1515_v23 = vld [vmem:[#allocation8 + $0x144] ss:$8 sps:$4 sm:$0xff]  }
  0x89   :  { %549 = vmatpush1.bf16.msra.mxu1 %v1417_v8 }
  0x8a   :  { %550 = vmatprep.subr.bf16.mxu1 %v1422_v9 }
  0x8b   :  { %1040 = vmatpush1.bf16.msra.mxu0 %v1494_v39  ;;  %v1539_v39 = vld [vmem:[#allocation8 + $0x1c4] ss:$8 sps:$4 sm:$0xff]  }
  0x8c   :  { %1041 = vmatprep.subr.bf16.mxu0 %v1495_v40  ;;  %v1537_v40 = vld [vmem:[#allocation8 + $0x1c0] ss:$8 sps:$4 sm:$0xff]  }
  0x8d   :  { %551 = vmatpush1.bf16.msra.mxu1 %v1420_v12  ;;  %v1504_v12 = vld [vmem:[#allocation8 + $0x110] ss:$8 sps:$4 sm:$0xff]  }
  0x8e   :  { %552 = vmatprep.subr.bf16.mxu1 %v1425_v13 }
  0x8f   :  { %1042 = vmatpush1.bf16.msra.mxu0 %v1497_v41  ;;  %v1542_v41 = vld [vmem:[#allocation8 + $0x1d4] ss:$8 sps:$4 sm:$0xff]  }
  0x90   :  { %1043 = vmatprep.subr.bf16.mxu0 %v1498_v42  ;;  %v157_v42 = vsub.s32 2, %v1759_v46 }
  0x91   :  { %553 = vmatpush1.bf16.msra.mxu1 %v1423_v16 }
  0x92   :  { %554 = vmatprep.subr.bf16.mxu1 %v1428_v17 }
  0x93   :  { %1044 = vmatpush1.bf16.msra.mxu0 %v1500_v43  ;;  %v161_v43 = vsub.s32 3, %v1759_v46 }
  0x94   :  { %1066 = vmatprep.subr.bf16.mxu0 %v1503_v44  ;;  %v1540_v44 = vld [vmem:[#allocation8 + $0x1d0] ss:$8 sps:$4 sm:$0xff]  }
  0x95   :  { %555 = vmatpush1.bf16.msra.mxu1 %v1426_v20 }
  0x96   :  { %556 = vmatprep.subr.bf16.mxu1 %v1431_v21  ;;  %v1512_v21 = vld [vmem:[#allocation8 + $0x134] ss:$8 sps:$4 sm:$0xff]  }
  0x99   :  { %557 = vmatpush1.bf16.msra.mxu1 %v1429_v24  ;;  %v1513_v24 = vld [vmem:[#allocation8 + $0x140] ss:$8 sps:$4 sm:$0xff]  }
  0x9a   :  { %558 = vmatprep.subr.bf16.mxu1 %v1434_v25  ;;  %v1518_v25 = vld [vmem:[#allocation8 + $0x154] ss:$8 sps:$4 sm:$0xff]  }
  0x9d   :  { %559 = vmatpush1.bf16.msra.mxu1 %v1432_v26  ;;  %v1516_v26 = vld [vmem:[#allocation8 + $0x150] ss:$8 sps:$4 sm:$0xff]  }
  0x9e   :  { %560 = vmatprep.subr.bf16.mxu1 %v1437_v27  ;;  %v1521_v27 = vld [vmem:[#allocation8 + $0x164] ss:$8 sps:$4 sm:$0xff]  }
  0xa1   :  { %561 = vmatpush1.bf16.msra.mxu1 %v1435_v28  ;;  %v1519_v28 = vld [vmem:[#allocation8 + $0x160] ss:$8 sps:$4 sm:$0xff]  }
  0xa2   :  { %562 = vmatprep.subr.bf16.mxu1 %v1440_v29  ;;  %v1524_v29 = vld [vmem:[#allocation8 + $0x174] ss:$8 sps:$4 sm:$0xff]  }
  0xa5   :  { %563 = vmatpush1.bf16.msra.mxu1 %v1438_v30  ;;  %v1522_v30 = vld [vmem:[#allocation8 + $0x170] ss:$8 sps:$4 sm:$0xff]  }
  0xa6   :  { %564 = vmatprep.subr.bf16.mxu1 %v1443_v31  ;;  %v1527_v31 = vld [vmem:[#allocation8 + $0x184] ss:$8 sps:$4 sm:$0xff]  }
  0xa9   :  { %565 = vmatpush1.bf16.msra.mxu1 %v1441_v32  ;;  %v1525_v32 = vld [vmem:[#allocation8 + $0x180] ss:$8 sps:$4 sm:$0xff]  }
  0xaa   :  { %566 = vmatprep.subr.bf16.mxu1 %v1446_v33  ;;  %v1530_v33 = vld [vmem:[#allocation8 + $0x194] ss:$8 sps:$4 sm:$0xff]  }
  0xad   :  { %567 = vmatpush1.bf16.msra.mxu1 %v1444_v34  ;;  %v1528_v34 = vld [vmem:[#allocation8 + $0x190] ss:$8 sps:$4 sm:$0xff]  }
  0xae   :  { %568 = vmatprep.subr.bf16.mxu1 %v1449_v35  ;;  %v1533_v35 = vld [vmem:[#allocation8 + $0x1a4] ss:$8 sps:$4 sm:$0xff]  }
  0xb1   :  { %569 = vmatpush1.bf16.msra.mxu1 %v1447_v36  ;;  %v1531_v36 = vld [vmem:[#allocation8 + $0x1a0] ss:$8 sps:$4 sm:$0xff]  }
  0xb2   :  { %570 = vmatprep.subr.bf16.mxu1 %v1452_v37  ;;  %v1536_v37 = vld [vmem:[#allocation8 + $0x1b4] ss:$8 sps:$4 sm:$0xff]  }
  0xb5   :  { %571 = vmatpush1.bf16.msra.mxu1 %v1450_v38  ;;  %v1534_v38 = vld [vmem:[#allocation8 + $0x1b0] ss:$8 sps:$4 sm:$0xff]  }
  0xb8   :  { %573 = vmatmul.mubr.bf16.vlgmr.msra.gmra.mrb[8].mxu1 %v1745_v50  ;;  %v150_v50 = vrot.slane %v1767_v48, %v1762_v47 }
  0xb9   :  { %582 = vmatprep.mubr.bf16.mxu1 %v1747_v54 }
  0xc0   :  { %583 = vmatmul.mubr.bf16.gmra.mrb[12].mxu1 %v1751_v1 }
 0x14b   :  { %v521_v52 = vpop.f32.mrb[0].mxu1 }
 0x14c   :  { %v522_v53 = vadd.f32 %v521_v52, %v150_v50  ;;  %v523_v54 = vpop.f32.mrb[1].mxu1  ;;  %v162_v52 = vrot.slane %v1767_v48, %v161_v43 }
 0x14d   :  { %v524_v55 = vadd.f32 %v523_v54, %v154_v51  ;;  %v525_v56 = vpop.f32.mrb[2].mxu1  ;;  %v1543_v54 = vld [vmem:[#allocation8 + $0x1e0] ss:$8 sps:$4 sm:$0xff]  }
 0x14e   :  { %v593_v57 = vmax.f32 %v522_v53, 0.0  ;;  %v526_v58 = vadd.f32 %v525_v56, %v150_v50  ;;  %v527_v59 = vpop.f32.mrb[3].mxu1 }
 0x14f   :  { %v528_v60 = vadd.f32 %v527_v59, %v154_v51  ;;  %v594_v62 = vmax.f32 %v524_v55, 0.0 }
 0x150   :  { %v597_v61 = vmax.f32 %v526_v58, 0.0 }
 0x151   :  { %v598_v63 = vmax.f32 %v528_v60, 0.0 }
 0x152   :  { %v609_v0 = vpack.c.bf16 %v597_v61, %v593_v57  ;;  %v1548_v57 = vld [vmem:[#allocation8 + $0x1f4] ss:$8 sps:$4 sm:$0xff]  }
 0x153   :  { %v610_v1 = vpack.c.bf16 %v598_v63, %v594_v62  ;;  %v531_v3 = vpop.f32.mrb[4].mxu1  ;;  %v1546_v63 = vld [vmem:[#allocation8 + $0x1f0] ss:$8 sps:$4 sm:$0xff]  }
 0x154   :  { %v532_v5 = vadd.f32 %v531_v3, %v150_v50  ;;  %v533_v6 = vpop.f32.mrb[5].mxu1 }
 0x155   :  { %1045 = vmatprep.mubr.bf16.mxu0 %v610_v1  ;;  %v534_v7 = vadd.f32 %v533_v6, %v154_v51  ;;  %v535_v8 = vpop.f32.mrb[6].mxu1 }
 0x156   :  { %1046 = vmatmul.mubr.bf16.vlgmr.msra.gmra.mrb[0].mxu0 %v609_v0  ;;  %v601_v9 = vmax.f32 %v532_v5, 0.0  ;;  %v536_v10 = vadd.f32 %v535_v8, %v150_v50  ;;  %v537_v11 = vpop.f32.mrb[7].mxu1  ;;  %v158_v50 = vrot.slane %v1767_v48, %v157_v42 }
 0x157   :  { %1067 = vmatpush1.bf16.msra.mxu0 %v1501_v2  ;;  %v602_v13 = vmax.f32 %v534_v7, 0.0  ;;  %v538_v14 = vadd.f32 %v537_v11, %v154_v51  ;;  %v1545_v51 = vld [vmem:[#allocation8 + $0x1e4] ss:$8 sps:$4 sm:$0xff]  }
 0x158   :  { %1068 = vmatprep.subr.bf16.mxu0 %v1506_v4  ;;  %v605_v16 = vmax.f32 %v536_v10, 0.0 }
 0x159   :  { %v606_v17 = vmax.f32 %v538_v14, 0.0 }
 0x15a   :  { %v613_v18 = vpack.c.bf16 %v605_v16, %v601_v9 }
 0x15b   :  { %1069 = vmatpush1.bf16.msra.mxu0 %v1504_v12  ;;  %v614_v20 = vpack.c.bf16 %v606_v17, %v602_v13 }
 0x15c   :  { %1070 = vmatprep.subr.bf16.mxu0 %v1509_v15 }
 0x15d   :  { %1055 = vmatprep.mubr.bf16.mxu0 %v614_v20 }
 0x15e   :  { %1056 = vmatmul.mubr.bf16.gmra.mrb[4].mxu0 %v613_v18 }
 0x15f   :  { %1071 = vmatpush1.bf16.msra.mxu0 %v1507_v19  ;;  %v681_v19 = vld [vmem:[%s1812_s4] sm:$0x3] }
 0x160   :  { %1072 = vmatprep.subr.bf16.mxu0 %v1512_v21 }
 0x163   :  { %1073 = vmatpush1.bf16.msra.mxu0 %v1510_v22 }
 0x164   :  { %1074 = vmatprep.subr.bf16.mxu0 %v1515_v23  ;;  %v686_v23 = vrot.slane %v681_v19, %v1762_v47 }
 0x167   :  { %1075 = vmatpush1.bf16.msra.mxu0 %v1513_v24 }
 0x168   :  { %1076 = vmatprep.subr.bf16.mxu0 %v1518_v25  ;;  %v690_v25 = vrot.slane %v681_v19, %v1770_v49 }
 0x16b   :  { %1077 = vmatpush1.bf16.msra.mxu0 %v1516_v26 }
 0x16c   :  { %1078 = vmatprep.subr.bf16.mxu0 %v1521_v27 }
 0x16f   :  { %1079 = vmatpush1.bf16.msra.mxu0 %v1519_v28 }
 0x170   :  { %1080 = vmatprep.subr.bf16.mxu0 %v1524_v29  ;;  %v1131_v29 = vld [vmem:[%s1813_s5] sm:$0x3] }
 0x173   :  { %1081 = vmatpush1.bf16.msra.mxu0 %v1522_v30 }
 0x174   :  { %1082 = vmatprep.subr.bf16.mxu0 %v1527_v31 }
 0x177   :  { %1083 = vmatpush1.bf16.msra.mxu0 %v1525_v32 }
 0x178   :  { %1084 = vmatprep.subr.bf16.mxu0 %v1530_v33 }
 0x17b   :  { %1085 = vmatpush1.bf16.msra.mxu0 %v1528_v34 }
 0x17c   :  { %1086 = vmatprep.subr.bf16.mxu0 %v1533_v35 }
 0x17f   :  { %1087 = vmatpush1.bf16.msra.mxu0 %v1531_v36 }
 0x180   :  { %1088 = vmatprep.subr.bf16.mxu0 %v1536_v37 }
 0x183   :  { %1089 = vmatpush1.bf16.msra.mxu0 %v1534_v38 }
 0x184   :  { %1090 = vmatprep.subr.bf16.mxu0 %v1539_v39 }
 0x187   :  { %1091 = vmatpush1.bf16.msra.mxu0 %v1537_v40  ;;  %v1136_v40 = vrot.slane %v1131_v29, %v1762_v47 }
 0x188   :  { %1092 = vmatprep.subr.bf16.mxu0 %v1542_v41 }
 0x18b   :  { %v574_v53 = vpop.f32.mrb[8].mxu1  ;;  %1093 = vmatpush1.bf16.msra.mxu0 %v1540_v44  ;;  %v1140_v44 = vrot.slane %v1131_v29, %v1770_v49  ;;  %v1154_v49 = vstv %s1814_s6  ;;  %s1658_s6 = smov [#allocation9]  }
 0x18c   :  { %v575_v55 = vadd.f32 %v574_v53, %v158_v50  ;;  %v576_v56 = vpop.f32.mrb[9].mxu1  ;;  %1094 = vmatprep.subr.bf16.mxu0 %v1545_v51  ;;  %s1193_s20 = sshll.u32 %s1658_s6, 4  ;;  %s1194_s20 = int_to_ptr.vmem [resolvable:$true] %s1193_s20 }
 0x18d   :  { %v577_v58 = vadd.f32 %v576_v56, %v162_v52  ;;  %v578_v59 = vpop.f32.mrb[10].mxu1  ;;  %s1623_s21 = scalar_lea.vmem %s1194_s20, 16  ;;  %s1627_s22 = scalar_lea.vmem %s1194_s20, 32 }
 0x18e   :  { %v579_v60 = vadd.f32 %v578_v59, %v158_v50  ;;  %v580_v61 = vpop.f32.mrb[11].mxu1  ;;  %v595_v0 = vmax.f32 %v575_v55, 0.0  ;;  %p1624_p10 = scmp.ne.s32.totalorder %s1194_s20, %s1623_s21  ;;  %p1628_p11 = scmp.lt.s32.totalorder %s1194_s20, %s1194_s20 }
 0x18f   :  { %v581_v62 = vadd.f32 %v580_v61, %v162_v52  ;;  %1095 = vmatpush1.bf16.msra.mxu0 %v1543_v54  ;;  %v596_v2 = vmax.f32 %v577_v58, 0.0  ;;  %p1629_p12 = scmp.lt.s32.totalorder %s1627_s22, %s1623_s21 }
 0x190   :  { %v599_v1 = vmax.f32 %v579_v60, 0.0  ;;  %1096 = vmatprep.subr.bf16.mxu0 %v1548_v57 }
 0x191   :  { %v600_v3 = vmax.f32 %v581_v62, 0.0  ;;  %p1630_p13 = por %p1629_p12, %p1628_p11 }
 0x192   :  { %v611_v48 = vpack.c.bf16 %v599_v1, %v595_v0 }
 0x193   :  { %v612_v4 = vpack.c.bf16 %v600_v3, %v596_v2  ;;  %v584_v5 = vpop.f32.mrb[12].mxu1  ;;  %1097 = vmatpush1.bf16.msra.mxu0 %v1546_v63  ;;  %p1631_p0 = pnand %p1630_p13, %p1624_p10 }
 0x194   :  { %v585_v6 = vadd.f32 %v584_v5, %v158_v50  ;;  %v586_v7 = vpop.f32.mrb[13].mxu1 }
 0x195   :  { %v587_v8 = vadd.f32 %v586_v7, %v162_v52  ;;  %v588_v9 = vpop.f32.mrb[14].mxu1  ;;  %1098 = vmatprep.mubr.bf16.mxu0 %v612_v4 }
 0x196   :  { %v589_v10 = vadd.f32 %v588_v9, %v158_v50  ;;  %v590_v11 = vpop.f32.mrb[15].mxu1  ;;  %1099 = vmatmul.mubr.bf16.vlgmr.msra.gmra.mrb[0].mxu0 %v611_v48  ;;  %v603_v13 = vmax.f32 %v585_v6, 0.0 }
 0x197   :  { %v591_v12 = vadd.f32 %v590_v11, %v162_v52  ;;  %v604_v15 = vmax.f32 %v587_v8, 0.0  ;;  %v1172_v8 = vand.u32 127, %v147_v45 }
 0x198   :  { %v607_v14 = vmax.f32 %v589_v10, 0.0 }
 0x199   :  { %v608_v16 = vmax.f32 %v591_v12, 0.0  ;;  %v1177_v9 = vadd.s32 4294967288, %v1172_v8  ;;  %v1175_v10 = vsub.s32 %v1172_v8, %v1759_v46 }
 0x19a   :  { %v615_v17 = vpack.c.bf16 %v607_v14, %v603_v13 }
 0x19b   :  { %v616_v18 = vpack.c.bf16 %v608_v16, %v604_v15  ;;  %v1180_v11 = vsub.s32 %v1177_v9, %v1759_v46 }
 0x19d   :  { %1108 = vmatprep.mubr.bf16.mxu0 %v616_v18 }
 0x19e   :  { %1109 = vmatmul.mubr.bf16.gmra.mrb[4].mxu0 %v615_v17 }
 0x269   :  { %v1100_v20 = vpop.f32.mrb[0].mxu0 }
 0x26a   :  { %v1102_v21 = vpop.f32.mrb[1].mxu0  ;;  %v1333_v26 = vadd.f32 %v1100_v20, %v686_v23 }
 0x26b   :  { %v1104_v22 = vpop.f32.mrb[2].mxu0  ;;  %v1334_v27 = vadd.f32 %v1102_v21, %v690_v25 }
 0x26c   :  { %v1106_v24 = vpop.f32.mrb[3].mxu0  ;;  %v1335_v30 = vadd.f32 %v1104_v22, %v686_v23  ;;  %v1119_v36 = vmax.f32 %v1333_v26, 0.0 }
 0x26d   :  { %v1336_v33 = vadd.f32 %v1106_v24, %v690_v25  ;;  %v1120_v41 = vmax.f32 %v1334_v27, 0.0 }
 0x26e   :  { %v1121_v50 = vmax.f32 %v1335_v30, 0.0 }
 0x26f   :  { %v1122_v53 = vmax.f32 %v1336_v33, 0.0 }
 0x271   :  { %v1110_v28 = vpop.f32.mrb[4].mxu0 }
 0x272   :  { %v1337_v31 = vadd.f32 %v1110_v28, %v686_v23  ;;  %v1112_v32 = vpop.f32.mrb[5].mxu0 }
 0x273   :  { %v1338_v34 = vadd.f32 %v1112_v32, %v690_v25  ;;  %v1114_v35 = vpop.f32.mrb[6].mxu0 }
 0x274   :  { %v1123_v37 = vmax.f32 %v1337_v31, 0.0  ;;  %v1339_v38 = vadd.f32 %v1114_v35, %v686_v23  ;;  %v1116_v39 = vpop.f32.mrb[7].mxu0 }
 0x275   :  { %v1124_v42 = vmax.f32 %v1338_v34, 0.0  ;;  %v1340_v43 = vadd.f32 %v1116_v39, %v690_v25 }
 0x276   :  { %v1127_v51 = vadd.f32 %v1123_v37, %v1119_v36  ;;  %v1125_v52 = vmax.f32 %v1339_v38, 0.0 }
 0x277   :  { %v1128_v54 = vadd.f32 %v1124_v42, %v1120_v41  ;;  %v1126_v55 = vmax.f32 %v1340_v43, 0.0 }
 0x278   :  { %v1129_v56 = vadd.f32 %v1125_v52, %v1121_v50  ;;  %v1143_v57 = vmul.f32 %v1136_v40, %v1127_v51 }
 0x279   :  { %v1130_v58 = vadd.f32 %v1126_v55, %v1122_v53  ;;  %v1144_v59 = vmul.f32 %v1140_v44, %v1128_v54 }
 0x27a   :  { %v1145_v60 = vmul.f32 %v1136_v40, %v1129_v56 }
 0x27b   :  { %v1147_v61 = vadd.f32 %v1144_v59, %v1143_v57  ;;  %v1146_v62 = vmul.f32 %v1140_v44, %v1130_v58 }
 0x27d   :  { %1148 = vadd.xlane.f32.xlu0 %v1147_v61  ;;  %v1150_v47 = vadd.f32 %v1146_v62, %v1145_v60 }
 0x281   :  { %1151 = vadd.xlane.f32.xlu0 %v1150_v47 }
 0x30a   :  { %v1149_v63 = vpop.xlane.xlu0 %1148 }
 0x30b   :  { %v1155_v0 = vadd.f32 %v1154_v49, %v1149_v63 }
 0x30d   :  { %v1331_v1 = vmul.f32 -1.442695, %v1155_v0 }
 0x30e   :  { %v1152_v2 = vpop.xlane.xlu0 %1151 }
 0x30f   :  { %1549 = vpow2.f32 %v1331_v1  ;;  %v1156_v3 = vadd.f32 %v1154_v49, %v1152_v2 }
 0x311   :  { %v1332_v48 = vmul.f32 -1.442695, %v1156_v3 }
 0x313   :  { %1551 = vpow2.f32 %v1332_v48 }
 0x319   :  { %v1550_v4 = vpop.eup %1549 }
 0x31a   :  { %v1163_v5 = vadd.f32 1.0, %v1550_v4 }
 0x31c   :  { %1553 = vrcp.f32 %v1163_v5 }
 0x31d   :  { %v1552_v6 = vpop.eup %1551 }
 0x31e   :  { %v1164_v7 = vadd.f32 1.0, %v1552_v6 }
 0x320   :  { %1555 = vrcp.f32 %v1164_v7 }
 0x326   :  { %v1554_v12 = vpop.eup %1553 }
 0x327   :  { %v1176_v14 = vrot.slane %v1554_v12, %v1175_v10 }
 0x32a   :  { %v1556_v13 = vpop.eup %1555 }
 0x32b   :  { %v1181_v15 = vrot.slane %v1556_v13, %v1180_v11 }
 0x32d   :  { %v1183_v16 = vsel %vm1182_vm0, %v1181_v15, %v1176_v14 }
 0x32e   :  { %1186 = vst.msk [vmem:[#allocation9] sm:$0x1] %vm1185_vm1, %v1183_v16 }
 0x32f   :  { %1634 = shalt.err (!%p1631_p0)
}
 0x330   :  { %s1635_s1 = scalar_lea.hbm %s1815_s7, 16 }
 0x331   :  { %p1636_p1 = scmp.ne.s32.totalorder %s1815_s7, %s1635_s1  ;;  %p1639_p2 = scmp.lt.u32.totalorder %s1635_s1, %s1815_s7 }
 0x333   :  { %p1641_p3 = pnand %p1639_p2, %p1636_p1 }
 0x335   :  { %1644 = shalt.err (!%p1641_p3)
}
 0x336   :  { %1196 = dma.vmem_to_hbm [thread:$0]  %s1194_s20, 16, %s1815_s7, [#allocation5]  }
 0x337   :  { %1649 = dma.done.wait [#allocation5], 16  }
 0x338   :  { %1650 = vsyncadd [#allocation5], 4294967280 }
 0x339   :  { %1200 = vsyncpa [#allocation4], 1 }
 0x33a   :  { %1201 = vsyncpa [#allocation7], 1 }
 0x33b   :  { %1202 = vsyncpa [#allocation5], 1 }

</bundles_post_ra>
